<compile_context>
chip_gen: v7x
topology: tpu7x:2x2x1
jax: 0.10.0
libtpu: 0.0.40
codegen_flags: <defaults>
</compile_context>

<pallas_src>
import functools

import jax
import jax.numpy as jnp
from jax.experimental import pallas as pl
from jax.experimental.pallas import tpu as pltpu


IN_DIM = 784
IN_PAD = 896          # 7 * 128, lane-aligned feature dimension
H1 = 512
H2 = 256
OUT_DIM = 1


def _round_up(n, m):
    return ((n + m - 1) // m) * m


def _leaky_relu(x, negative_slope=0.2):
    return jnp.where(x > 0, x, negative_slope * x)


def discriminator_kernel(x_ref, w1_ref, b1_ref, w2_ref, b2_ref, w3_ref, b3_ref,
                         out_ref):
    # x_ref: (TB, 896) bf16 tile of the (padded) batch.
    x = x_ref[...]

    # Layer 1: (TB,896) @ (896,512), bf16 operands, f32 MXU accumulation.
    h1 = jnp.dot(x, w1_ref[...], preferred_element_type=jnp.float32)
    h1 = _leaky_relu(h1 + b1_ref[...])

    # Layer 2: (TB,512) @ (512,256).
    h2 = jnp.dot(h1.astype(jnp.bfloat16), w2_ref[...],
                 preferred_element_type=jnp.float32)
    h2 = _leaky_relu(h2 + b2_ref[...])

    # Output layer: N=1, so skip the MXU — VPU multiply + XLU lane reduction.
    logits = jnp.sum(h2 * w3_ref[...], axis=-1, keepdims=True) + b3_ref[...]
    out_ref[...] = jax.nn.sigmoid(logits).astype(out_ref.dtype)


@functools.partial(jax.jit, static_argnames=("batch_tile",))
def discriminator_forward(x, params, batch_tile=256):
    """x: (B, 784) float32. params: f32 (in,out)-layout weights. -> (B, 1)."""
    w1, b1, w2, b2, w3, b3 = params
    B = x.shape[0]

    # --- prepare kernel-side operands (cheap, fused under jit) -------------
    # Pad features to 896 lanes, pad w1 with matching zero rows, cast matmul
    # operands to bf16; biases stay f32; w3 becomes a (1, 256) row for the
    # VPU reduction path.
    xk = jnp.pad(x.astype(jnp.bfloat16), ((0, 0), (0, IN_PAD - IN_DIM)))
    w1k = jnp.pad(w1, ((0, IN_PAD - IN_DIM), (0, 0))).astype(jnp.bfloat16)
    w2k = w2.astype(jnp.bfloat16)
    w3k = w3.reshape(1, H2)           # (256, 1) column -> (1, 256) row
    b3k = b3.reshape(1, OUT_DIM)

    # --- choose the batch tile ----------------------------------------------
    # Big for MXU row utilisation / fewer grid steps, but keep >= 2 grid steps
    # when possible so v7x's two TensorCores both get work.
    tile = min(batch_tile, max(8, _round_up(-(-B // 2), 8)))
    Bp = _round_up(B, tile)
    if Bp != B:
        xk = jnp.pad(xk, ((0, Bp - B), (0, 0)))
    grid = (Bp // tile,)

    # Batch-tiled input / output; full-extent (VMEM-resident) weight blocks.
    x_spec = pl.BlockSpec((tile, IN_PAD), lambda i: (i, 0))
    w1_spec = pl.BlockSpec((IN_PAD, H1), lambda i: (0, 0))
    b1_spec = pl.BlockSpec((1, H1), lambda i: (0, 0))
    w2_spec = pl.BlockSpec((H1, H2), lambda i: (0, 0))
    b2_spec = pl.BlockSpec((1, H2), lambda i: (0, 0))
    w3_spec = pl.BlockSpec((1, H2), lambda i: (0, 0))
    b3_spec = pl.BlockSpec((1, OUT_DIM), lambda i: (0, 0))
    out_spec = pl.BlockSpec((tile, OUT_DIM), lambda i: (i, 0))

    out = pl.pallas_call(
        discriminator_kernel,
        out_shape=jax.ShapeDtypeStruct((Bp, OUT_DIM), jnp.float32),
        grid_spec=pltpu.PrefetchScalarGridSpec(
            num_scalar_prefetch=0,
            grid=grid,
            in_specs=[x_spec, w1_spec, b1_spec, w2_spec, b2_spec, w3_spec,
                      b3_spec],
            out_specs=out_spec,
        ),
        compiler_params=pltpu.CompilerParams(
            dimension_semantics=("parallel",)),
    )(xk, w1k, b1, w2k, b2, w3k, b3k)

    return out[:B]


def init_params(key):
    """Mirrors nn.Linear's default U(-1/sqrt(in), 1/sqrt(in)) init.

    Weights stored as (in_features, out_features) in f32; the forward wrapper
    handles padding / bf16 casting for the kernel.
    """
    keys = jax.random.split(key, 6)

    def linear(kw, kb, fan_in, fan_out):
        bound = 1.0 / jnp.sqrt(jnp.float32(fan_in))
        w = jax.random.uniform(kw, (fan_in, fan_out), jnp.float32,
                               minval=-bound, maxval=bound)
        b = jax.random.uniform(kb, (1, fan_out), jnp.float32,
                               minval=-bound, maxval=bound)
        return w, b

    w1, b1 = linear(keys[0], keys[1], IN_DIM, H1)
    w2, b2 = linear(keys[2], keys[3], H1, H2)
    w3, b3 = linear(keys[4], keys[5], H2, OUT_DIM)
    return (w1, b1, w2, b2, w3, b3)


def reference_forward(x, params):
    """Plain-JAX f32 reference (matches PyTorch module semantics)."""
    w1, b1, w2, b2, w3, b3 = params
    h = x @ w1 + b1
    h = jnp.where(h > 0, h, 0.2 * h)
    h = h @ w2 + b2
    h = jnp.where(h > 0, h, 0.2 * h)
    return jax.nn.sigmoid(h @ w3 + b3)


if __name__ == "__main__":
    key = jax.random.PRNGKey(0)
    pkey, xkey = jax.random.split(key)

    params = init_params(pkey)

    # Small batch of flattened 28x28 "images": (200, 784).
    # 200 is deliberately NOT a multiple of the tile to exercise batch padding.
    batch = 200
    x = jax.random.normal(xkey, (batch, IN_DIM), dtype=jnp.float32)

    scores = discriminator_forward(x, params)
    scores = jax.block_until_ready(scores)

    ref = reference_forward(x, params)
    assert scores.shape == (batch, OUT_DIM)
    max_err = jnp.max(jnp.abs(scores - ref))
    # bf16 matmul operands (f32 accumulation) vs f32 reference -> loose tol.
    assert max_err < 2e-2, f"max abs err {max_err}"

    print("KERNEL_OK")
</pallas_src>

<mosaic_0001>
module attributes {stable_mosaic.version = 11 : i64} {
  func.func @discriminator_kernel(%arg0: i32, %arg1: memref<104x896xbf16, #tpu.memory_space<vmem>>, %arg2: memref<896x512xbf16, #tpu.memory_space<vmem>>, %arg3: memref<1x512xf32, #tpu.memory_space<vmem>>, %arg4: memref<512x256xbf16, #tpu.memory_space<vmem>>, %arg5: memref<1x256xf32, #tpu.memory_space<vmem>>, %arg6: memref<1x256xf32, #tpu.memory_space<vmem>>, %arg7: memref<1x1xf32, #tpu.memory_space<vmem>>, %arg8: memref<104x1xf32, #tpu.memory_space<vmem>>) attributes {dimension_semantics = [#tpu.dimension_semantics<parallel>], iteration_bounds = array<i64: 2>, scalar_prefetch = 0 : i64, scratch_operands = 0 : i64, tpu.core_type = #tpu.core_type<tc>, window_params = [{transform_indices = @transform_0, window_bounds = array<i64: 104, 896>}, {pipeline_mode = #tpu.pipeline_mode<synchronous>, transform_indices = @transform_1, window_bounds = array<i64: 896, 512>}, {pipeline_mode = #tpu.pipeline_mode<synchronous>, transform_indices = @transform_2, window_bounds = array<i64: 1, 512>}, {pipeline_mode = #tpu.pipeline_mode<synchronous>, transform_indices = @transform_3, window_bounds = array<i64: 512, 256>}, {pipeline_mode = #tpu.pipeline_mode<synchronous>, transform_indices = @transform_4, window_bounds = array<i64: 1, 256>}, {pipeline_mode = #tpu.pipeline_mode<synchronous>, transform_indices = @transform_5, window_bounds = array<i64: 1, 256>}, {pipeline_mode = #tpu.pipeline_mode<synchronous>, transform_indices = @transform_6, window_bounds = array<i64: 1, 1>}, {transform_indices = @transform_7, window_bounds = array<i64: 104, 1>}]} {
    %c0 = arith.constant 0 : index
    %c0_0 = arith.constant 0 : index
    %0 = vector.load %arg1[%c0, %c0_0] : memref<104x896xbf16, #tpu.memory_space<vmem>>, vector<104x896xbf16>
    %c0_1 = arith.constant 0 : index
    %c0_2 = arith.constant 0 : index
    %1 = vector.load %arg2[%c0_1, %c0_2] : memref<896x512xbf16, #tpu.memory_space<vmem>>, vector<896x512xbf16>
    %cst = arith.constant dense<0.000000e+00> : vector<104x512xf32>
    %2 = tpu.matmul %0, %1, %cst {dimension_numbers = #tpu.dot_dimension_numbers<[1], [0], [0], [1], [0, 0, 1, 1], [], []>} : vector<104x896xbf16>, vector<896x512xbf16>, vector<104x512xf32> -> vector<104x512xf32>
    %c0_3 = arith.constant 0 : index
    %c0_4 = arith.constant 0 : index
    %3 = vector.load %arg3[%c0_3, %c0_4] : memref<1x512xf32, #tpu.memory_space<vmem>>, vector<1x512xf32>
    %4 = vector.broadcast %3 : vector<1x512xf32> to vector<104x512xf32>
    %5 = arith.addf %2, %4 : vector<104x512xf32>
    %cst_5 = arith.constant 0.000000e+00 : f32
    %6 = vector.broadcast %cst_5 : f32 to vector<104x512xf32>
    %7 = arith.cmpf ogt, %5, %6 : vector<104x512xf32>
    %cst_6 = arith.constant 2.000000e-01 : f32
    %8 = vector.broadcast %cst_6 : f32 to vector<104x512xf32>
    %9 = arith.mulf %8, %5 : vector<104x512xf32>
    %10 = arith.select %7, %5, %9 : vector<104x512xi1>, vector<104x512xf32>
    %11 = arith.truncf %10 : vector<104x512xf32> to vector<104x512xbf16>
    %c0_7 = arith.constant 0 : index
    %c0_8 = arith.constant 0 : index
    %12 = vector.load %arg4[%c0_7, %c0_8] : memref<512x256xbf16, #tpu.memory_space<vmem>>, vector<512x256xbf16>
    %cst_9 = arith.constant dense<0.000000e+00> : vector<104x256xf32>
    %13 = tpu.matmul %11, %12, %cst_9 {dimension_numbers = #tpu.dot_dimension_numbers<[1], [0], [0], [1], [0, 0, 1, 1], [], []>} : vector<104x512xbf16>, vector<512x256xbf16>, vector<104x256xf32> -> vector<104x256xf32>
    %c0_10 = arith.constant 0 : index
    %c0_11 = arith.constant 0 : index
    %14 = vector.load %arg5[%c0_10, %c0_11] : memref<1x256xf32, #tpu.memory_space<vmem>>, vector<1x256xf32>
    %15 = vector.broadcast %14 : vector<1x256xf32> to vector<104x256xf32>
    %16 = arith.addf %13, %15 : vector<104x256xf32>
    %cst_12 = arith.constant 0.000000e+00 : f32
    %17 = vector.broadcast %cst_12 : f32 to vector<104x256xf32>
    %18 = arith.cmpf ogt, %16, %17 : vector<104x256xf32>
    %cst_13 = arith.constant 2.000000e-01 : f32
    %19 = vector.broadcast %cst_13 : f32 to vector<104x256xf32>
    %20 = arith.mulf %19, %16 : vector<104x256xf32>
    %21 = arith.select %18, %16, %20 : vector<104x256xi1>, vector<104x256xf32>
    %c0_14 = arith.constant 0 : index
    %c0_15 = arith.constant 0 : index
    %22 = vector.load %arg6[%c0_14, %c0_15] : memref<1x256xf32, #tpu.memory_space<vmem>>, vector<1x256xf32>
    %23 = vector.broadcast %22 : vector<1x256xf32> to vector<104x256xf32>
    %24 = arith.mulf %21, %23 : vector<104x256xf32>
    %cst_16 = arith.constant dense<0.000000e+00> : vector<104xf32>
    %25 = vector.multi_reduction <add>, %24, %cst_16 [1] : vector<104x256xf32> to vector<104xf32>
    %26 = vector.shape_cast %25 : vector<104xf32> to vector<104x1xf32>
    %c0_17 = arith.constant 0 : index
    %c0_18 = arith.constant 0 : index
    %27 = vector.load %arg7[%c0_17, %c0_18] : memref<1x1xf32, #tpu.memory_space<vmem>>, vector<1x1xf32>
    %28 = vector.broadcast %27 : vector<1x1xf32> to vector<104x1xf32>
    %29 = arith.addf %26, %28 : vector<104x1xf32>
    %30 = arith.negf %29 : vector<104x1xf32>
    %31 = math.exp %30 : vector<104x1xf32>
    %cst_19 = arith.constant 1.000000e+00 : f32
    %32 = vector.broadcast %cst_19 : f32 to vector<104x1xf32>
    %33 = arith.addf %32, %31 : vector<104x1xf32>
    %34 = arith.divf %32, %33 : vector<104x1xf32>
    %c0_20 = arith.constant 0 : index
    %c0_21 = arith.constant 0 : index
    %35 = vector.load %arg8[%c0_20, %c0_21] : memref<104x1xf32, #tpu.memory_space<vmem>>, vector<104x1xf32>
    tpu.vector_store %arg8[%c0_20, %c0_21], %34 {strides = array<i32>} : memref<104x1xf32, #tpu.memory_space<vmem>>, vector<104x1xf32>,
    return
  }
  func.func @transform_0(%arg0: i32) -> (i32, i32) {
    %c0_i32 = arith.constant 0 : i32
    %c0_i32_0 = arith.constant 0 : i32
    return %arg0, %c0_i32 : i32, i32
  }
  func.func @transform_1(%arg0: i32) -> (i32, i32) {
    %c0_i32 = arith.constant 0 : i32
    %c0_i32_0 = arith.constant 0 : i32
    %c0_i32_1 = arith.constant 0 : i32
    return %c0_i32, %c0_i32_0 : i32, i32
  }
  func.func @transform_2(%arg0: i32) -> (i32, i32) {
    %c0_i32 = arith.constant 0 : i32
    %c0_i32_0 = arith.constant 0 : i32
    %c0_i32_1 = arith.constant 0 : i32
    return %c0_i32, %c0_i32_0 : i32, i32
  }
  func.func @transform_3(%arg0: i32) -> (i32, i32) {
    %c0_i32 = arith.constant 0 : i32
    %c0_i32_0 = arith.constant 0 : i32
    %c0_i32_1 = arith.constant 0 : i32
    return %c0_i32, %c0_i32_0 : i32, i32
  }
  func.func @transform_4(%arg0: i32) -> (i32, i32) {
    %c0_i32 = arith.constant 0 : i32
    %c0_i32_0 = arith.constant 0 : i32
    %c0_i32_1 = arith.constant 0 : i32
    return %c0_i32, %c0_i32_0 : i32, i32
  }
  func.func @transform_5(%arg0: i32) -> (i32, i32) {
    %c0_i32 = arith.constant 0 : i32
    %c0_i32_0 = arith.constant 0 : i32
    %c0_i32_1 = arith.constant 0 : i32
    return %c0_i32, %c0_i32_0 : i32, i32
  }
  func.func @transform_6(%arg0: i32) -> (i32, i32) {
    %c0_i32 = arith.constant 0 : i32
    %c0_i32_0 = arith.constant 0 : i32
    %c0_i32_1 = arith.constant 0 : i32
    return %c0_i32, %c0_i32_0 : i32, i32
  }
  func.func @transform_7(%arg0: i32) -> (i32, i32) {
    %c0_i32 = arith.constant 0 : i32
    %c0_i32_0 = arith.constant 0 : i32
    return %arg0, %c0_i32 : i32, i32
  }
}

</mosaic_0001>

<bundles_post_ra>
// kernel: discriminator_forward.1
= control target key start
LH: loop header
LB: loop body
LE: loop exit
PB: predicated region body
PF: predicated region fallthrough
CT: control target
= control target key end

     0   :  { %s5112_s26 = smov 0   ;;  %s6508_s0 = inlined_call_operand.vmem [shape: bf16[208,896], index: 0, kind: input, shape index: {}]   ;;  %s6509_s1 = inlined_call_operand.vmem [shape: bf16[896,512], index: 1, kind: input, shape index: {}]   ;;  %s6510_s2 = inlined_call_operand.vmem [shape: f32[1,512], index: 2, kind: input, shape index: {}]   ;;  %s6511_s3 = inlined_call_operand.vmem [shape: bf16[512,256], index: 3, kind: input, shape index: {}]   ;;  %s6512_s4 = inlined_call_operand.vmem [shape: f32[1,256], index: 4, kind: input, shape index: {}]   ;;  %s6513_s5 = inlined_call_operand.vmem [shape: f32[1,256], index: 5, kind: input, shape index: {}]   ;;  %s6514_s6 = inlined_call_operand.<no memory space> [shape: f32[1,1], index: 6, kind: input, shape index: {}]   ;;  %s6515_s7 = inlined_call_operand.vmem [shape: f32[208,1], index: 7, kind: output, shape index: {}]  }
   0x1   :  { %v12_v0 = vstv %s6514_s6 }
   0x2   :  { %13 = vst [vmem:[#allocation2] sm:$0x1] %v12_v0 }
   0x3 LB: > { %s3860_s27 = sadd.s32 4294967295, %s5066_s26   ;;  %p3864_p0 = scmp.ge.s32.totalorder %s5066_s26, 1  ;;  %s5066_s26 = sphi %s5112_s26, %s19_s26  }
   0x4   : > { %p241_p1 = scmp.lt.s32.totalorder %s5066_s26, 3 }
   0x6   : > { %p242_p2 = pnand %p3864_p0, %p241_p1 }
   0x7   : > { %v4502_v1 = vld [vmem:[%s6509_s1 + $0x4] ss:$16 sps:$4 sm:$0xff] (!%p242_p2)   ;;  %v4506_v3 = vld [vmem:[%s6509_s1] ss:$16 sps:$4 sm:$0xff] (!%p242_p2)   ;;  %s274_s18 = smul.u32 (!%p242_p2), 13, %s3860_s27 }
   0x8   : > { %245 = sbr.rel (%p242_p2) target bundleno = 984 (0x3d8), region = 48  ;;  %v4504_v2 = vld [vmem:[%s6509_s1 + $0x204] ss:$16 sps:$4 sm:$0xff] (!%p242_p2)   ;;  %1947 = vmatprep.subr.bf16.mxu1 (!%p242_p2), %v4502_v1  ;;  %v4507_v4 = vld [vmem:[%s6509_s1 + $0x200] ss:$16 sps:$4 sm:$0xff] (!%p242_p2)  }
   0x9   : > { %2048 = vmatprep.subr.bf16.mxu0 (!%p242_p2), %v4504_v2  ;;  %v4508_v5 = vld [vmem:[%s6509_s1 + $0x24] ss:$16 sps:$4 sm:$0xff] (!%p242_p2)   ;;  %1948 = vmatpush1.bf16.msra.mxu1 (!%p242_p2), %v4506_v3  ;;  %v4512_v7 = vld [vmem:[%s6509_s1 + $0x20] ss:$16 sps:$4 sm:$0xff] (!%p242_p2)   ;;  %p275_p3 = scmp.lt.s32.totalorder (!%p242_p2), %s274_s18, 25 }
   0xa   : > { %2049 = vmatpush1.bf16.msra.mxu0 (!%p242_p2), %v4507_v4  ;;  %v4510_v6 = vld [vmem:[%s6509_s1 + $0x224] ss:$16 sps:$4 sm:$0xff] (!%p242_p2)   ;;  %1949 = vmatprep.subr.bf16.mxu1 (!%p242_p2), %v4508_v5  ;;  %v4513_v8 = vld [vmem:[%s6509_s1 + $0x220] ss:$16 sps:$4 sm:$0xff] (!%p242_p2)   ;;  %v4609_v4 = vld [vmem:[%s6509_s1 + $0xc] ss:$16 sps:$4 sm:$0xff] (!%p242_p2)  }
   0xb   : > { %2050 = vmatprep.subr.bf16.mxu0 (!%p242_p2), %v4510_v6  ;;  %v4514_v9 = vld [vmem:[%s6509_s1 + $0x44] ss:$16 sps:$4 sm:$0xff] (!%p242_p2)   ;;  %v4518_v11 = vld [vmem:[%s6509_s1 + $0x40] ss:$16 sps:$4 sm:$0xff] (!%p242_p2)  }
   0xc   : > { %v4516_v10 = vld [vmem:[%s6509_s1 + $0x244] ss:$16 sps:$4 sm:$0xff] (!%p242_p2)   ;;  %v4519_v12 = vld [vmem:[%s6509_s1 + $0x240] ss:$16 sps:$4 sm:$0xff] (!%p242_p2)  }
   0xd   : > { %1950 = vmatpush1.bf16.msra.mxu1 (!%p242_p2), %v4512_v7  ;;  %v4520_v13 = vld [vmem:[%s6509_s1 + $0x64] ss:$16 sps:$4 sm:$0xff] (!%p242_p2)   ;;  %v4524_v15 = vld [vmem:[%s6509_s1 + $0x60] ss:$16 sps:$4 sm:$0xff] (!%p242_p2)  }
   0xe   : > { %2051 = vmatpush1.bf16.msra.mxu0 (!%p242_p2), %v4513_v8  ;;  %1951 = vmatprep.subr.bf16.mxu1 (!%p242_p2), %v4514_v9  ;;  %v4522_v14 = vld [vmem:[%s6509_s1 + $0x264] ss:$16 sps:$4 sm:$0xff] (!%p242_p2)   ;;  %v4525_v16 = vld [vmem:[%s6509_s1 + $0x260] ss:$16 sps:$4 sm:$0xff] (!%p242_p2)   ;;  %v4607_v8 = vld [vmem:[%s6509_s1 + $0x8] ss:$16 sps:$4 sm:$0xff] (!%p242_p2)  }
   0xf   : > { %2052 = vmatprep.subr.bf16.mxu0 %v4516_v10  ;;  %v4526_v17 = vld [vmem:[%s6509_s1 + $0x84] ss:$16 sps:$4 sm:$0xff]   ;;  %v4530_v19 = vld [vmem:[%s6509_s1 + $0x80] ss:$16 sps:$4 sm:$0xff]   ;;  %s6517_s18 = smov (!%p275_p3, %s274_s18), 25 }
  0x10   : > { %v4528_v18 = vld [vmem:[%s6509_s1 + $0x284] ss:$16 sps:$4 sm:$0xff]   ;;  %v4531_v20 = vld [vmem:[%s6509_s1 + $0x280] ss:$16 sps:$4 sm:$0xff]   ;;  %s4492_s21 = smul.u32 28, %s6517_s18  ;;  %s3866_s11 = sshll.u32 %s6517_s18, 3 }
  0x11   : > { %1952 = vmatpush1.bf16.msra.mxu1 %v4518_v11  ;;  %v4532_v21 = vld [vmem:[%s6509_s1 + $0xa4] ss:$16 sps:$4 sm:$0xff]   ;;  %v4536_v23 = vld [vmem:[%s6509_s1 + $0xa0] ss:$16 sps:$4 sm:$0xff]   ;;  %v4615_v10 = vld [vmem:[%s6509_s1 + $0x2c] ss:$16 sps:$4 sm:$0xff]   ;;  %s6471_s14 = scalar_lea.vmem %s6515_s7, %s3866_s11 }
  0x12   : > { %2053 = vmatpush1.bf16.msra.mxu0 %v4519_v12  ;;  %1953 = vmatprep.subr.bf16.mxu1 %v4520_v13  ;;  %v4534_v22 = vld [vmem:[%s6509_s1 + $0x2a4] ss:$16 sps:$4 sm:$0xff]   ;;  %v4537_v24 = vld [vmem:[%s6509_s1 + $0x2a0] ss:$16 sps:$4 sm:$0xff]   ;;  %s5263_s9 = scalar_lea.vmem %s6508_s0, %s4492_s21 }
  0x13   : > { %2054 = vmatprep.subr.bf16.mxu0 %v4522_v14  ;;  %v4538_v25 = vld [vmem:[%s6509_s1 + $0xc4] ss:$16 sps:$4 sm:$0xff]   ;;  %v4542_v27 = vld [vmem:[%s6509_s1 + $0xc0] ss:$16 sps:$4 sm:$0xff]   ;;  %v4603_v52 = vld [vmem:[%s5263_s9 + $0xc] ss:$28 sps:$4 sm:$0xff]  }
  0x14   : > { %v4540_v26 = vld [vmem:[%s6509_s1 + $0x2c4] ss:$16 sps:$4 sm:$0xff]   ;;  %v4543_v28 = vld [vmem:[%s6509_s1 + $0x2c0] ss:$16 sps:$4 sm:$0xff]   ;;  %2080 = vmatprep.mubr.bf16.mxu0 %v4603_v52  ;;  %v5350_v11 = vld [vmem:[%s5263_s9 + $0x3c] ss:$28 sps:$4 sm:$0xff]  }
  0x15   : > { %1954 = vmatpush1.bf16.msra.mxu1 %v4524_v15  ;;  %v4544_v29 = vld [vmem:[%s6509_s1 + $0xe4] ss:$16 sps:$4 sm:$0xff]   ;;  %v4548_v31 = vld [vmem:[%s6509_s1 + $0xe0] ss:$16 sps:$4 sm:$0xff]   ;;  %v4613_v14 = vld [vmem:[%s6509_s1 + $0x28] ss:$16 sps:$4 sm:$0xff]  }
  0x16   : > { %2055 = vmatpush1.bf16.msra.mxu0 %v4525_v16  ;;  %1955 = vmatprep.subr.bf16.mxu1 %v4526_v17  ;;  %v4546_v30 = vld [vmem:[%s6509_s1 + $0x2e4] ss:$16 sps:$4 sm:$0xff]   ;;  %v4549_v32 = vld [vmem:[%s6509_s1 + $0x2e0] ss:$16 sps:$4 sm:$0xff]   ;;  %v4621_v16 = vld [vmem:[%s6509_s1 + $0x4c] ss:$16 sps:$4 sm:$0xff]  }
  0x17   : > { %2056 = vmatprep.subr.bf16.mxu0 %v4528_v18  ;;  %v4550_v33 = vld [vmem:[%s6509_s1 + $0x104] ss:$16 sps:$4 sm:$0xff]   ;;  %v4554_v35 = vld [vmem:[%s6509_s1 + $0x100] ss:$16 sps:$4 sm:$0xff]   ;;  %v4619_v18 = vld [vmem:[%s6509_s1 + $0x48] ss:$16 sps:$4 sm:$0xff]  }
  0x18   : > { %v4552_v34 = vld [vmem:[%s6509_s1 + $0x304] ss:$16 sps:$4 sm:$0xff]   ;;  %v4555_v36 = vld [vmem:[%s6509_s1 + $0x300] ss:$16 sps:$4 sm:$0xff]  }
  0x19   : > { %1956 = vmatpush1.bf16.msra.mxu1 %v4530_v19  ;;  %v4556_v37 = vld [vmem:[%s6509_s1 + $0x124] ss:$16 sps:$4 sm:$0xff]   ;;  %v4560_v39 = vld [vmem:[%s6509_s1 + $0x120] ss:$16 sps:$4 sm:$0xff]  }
  0x1a   : > { %2057 = vmatpush1.bf16.msra.mxu0 %v4531_v20  ;;  %1957 = vmatprep.subr.bf16.mxu1 %v4532_v21  ;;  %v4558_v38 = vld [vmem:[%s6509_s1 + $0x324] ss:$16 sps:$4 sm:$0xff]   ;;  %v4561_v40 = vld [vmem:[%s6509_s1 + $0x320] ss:$16 sps:$4 sm:$0xff]  }
  0x1b   : > { %2058 = vmatprep.subr.bf16.mxu0 %v4534_v22  ;;  %v4562_v41 = vld [vmem:[%s6509_s1 + $0x144] ss:$16 sps:$4 sm:$0xff]   ;;  %v4566_v43 = vld [vmem:[%s6509_s1 + $0x140] ss:$16 sps:$4 sm:$0xff]   ;;  %v4627_v22 = vld [vmem:[%s6509_s1 + $0x6c] ss:$16 sps:$4 sm:$0xff]  }
  0x1c   : > { %v4564_v42 = vld [vmem:[%s6509_s1 + $0x344] ss:$16 sps:$4 sm:$0xff]   ;;  %v4567_v44 = vld [vmem:[%s6509_s1 + $0x340] ss:$16 sps:$4 sm:$0xff]  }
  0x1d   : > { %1958 = vmatpush1.bf16.msra.mxu1 %v4536_v23  ;;  %v4568_v45 = vld [vmem:[%s6509_s1 + $0x164] ss:$16 sps:$4 sm:$0xff]   ;;  %v4572_v47 = vld [vmem:[%s6509_s1 + $0x160] ss:$16 sps:$4 sm:$0xff]  }
  0x1e   : > { %2059 = vmatpush1.bf16.msra.mxu0 %v4537_v24  ;;  %1959 = vmatprep.subr.bf16.mxu1 %v4538_v25  ;;  %v4570_v46 = vld [vmem:[%s6509_s1 + $0x364] ss:$16 sps:$4 sm:$0xff]   ;;  %v4573_v48 = vld [vmem:[%s6509_s1 + $0x360] ss:$16 sps:$4 sm:$0xff]   ;;  %v4649_v24 = vld [vmem:[%s5263_s9 + $0x7c] ss:$28 sps:$4 sm:$0xff]  }
  0x1f   : > { %2060 = vmatprep.subr.bf16.mxu0 %v4540_v26  ;;  %v4574_v49 = vld [vmem:[%s6509_s1 + $0x184] ss:$16 sps:$4 sm:$0xff]   ;;  %v4578_v53 = vld [vmem:[%s6509_s1 + $0x180] ss:$16 sps:$4 sm:$0xff]   ;;  %v4625_v26 = vld [vmem:[%s6509_s1 + $0x68] ss:$16 sps:$4 sm:$0xff]  }
  0x20   : > { %v5278_v50 = vld [vmem:[%s5263_s9 + $0x4] ss:$28 sps:$4 sm:$0xff]   ;;  %v5374_v19 = vld [vmem:[%s5263_s9 + $0x38] ss:$28 sps:$4 sm:$0xff]  }
  0x21   : > { %1960 = vmatpush1.bf16.msra.mxu1 %v4542_v27  ;;  %v4576_v51 = vld [vmem:[%s6509_s1 + $0x384] ss:$16 sps:$4 sm:$0xff]   ;;  %1979 = vmatprep.mubr.bf16.mxu1 %v5278_v50  ;;  %v4579_v54 = vld [vmem:[%s6509_s1 + $0x380] ss:$16 sps:$4 sm:$0xff]  }
  0x22   : > { %2061 = vmatpush1.bf16.msra.mxu0 %v4543_v28  ;;  %1961 = vmatprep.subr.bf16.mxu1 %v4544_v29  ;;  %v4580_v55 = vld [vmem:[%s6509_s1 + $0x1a4] ss:$16 sps:$4 sm:$0xff]   ;;  %v4584_v57 = vld [vmem:[%s6509_s1 + $0x1a0] ss:$16 sps:$4 sm:$0xff]   ;;  %v4639_v28 = vld [vmem:[%s6509_s1 + $0x8c] ss:$16 sps:$4 sm:$0xff]  }
  0x23   : > { %2062 = vmatprep.subr.bf16.mxu0 %v4546_v30  ;;  %v4582_v56 = vld [vmem:[%s6509_s1 + $0x3a4] ss:$16 sps:$4 sm:$0xff]   ;;  %v4585_v58 = vld [vmem:[%s6509_s1 + $0x3a0] ss:$16 sps:$4 sm:$0xff]   ;;  %v4637_v30 = vld [vmem:[%s6509_s1 + $0x88] ss:$16 sps:$4 sm:$0xff]  }
  0x24   : > { %v4586_v59 = vld [vmem:[%s6509_s1 + $0x1c4] ss:$16 sps:$4 sm:$0xff]   ;;  %v4590_v61 = vld [vmem:[%s6509_s1 + $0x1c0] ss:$16 sps:$4 sm:$0xff]  }
  0x25   : > { %1962 = vmatpush1.bf16.msra.mxu1 %v4548_v31  ;;  %v4588_v60 = vld [vmem:[%s6509_s1 + $0x3c4] ss:$16 sps:$4 sm:$0xff]   ;;  %v4591_v62 = vld [vmem:[%s6509_s1 + $0x3c0] ss:$16 sps:$4 sm:$0xff]  }
  0x26   : > { %2063 = vmatpush1.bf16.msra.mxu0 %v4549_v32  ;;  %1963 = vmatprep.subr.bf16.mxu1 %v4550_v33  ;;  %v4592_v63 = vld [vmem:[%s6509_s1 + $0x1e4] ss:$16 sps:$4 sm:$0xff]   ;;  %v4596_v1 = vld [vmem:[%s6509_s1 + $0x1e0] ss:$16 sps:$4 sm:$0xff]  }
  0x27   : > { %2064 = vmatprep.subr.bf16.mxu0 %v4552_v34  ;;  %v4594_v0 = vld [vmem:[%s6509_s1 + $0x3e4] ss:$16 sps:$4 sm:$0xff]   ;;  %v4597_v2 = vld [vmem:[%s6509_s1 + $0x3e0] ss:$16 sps:$4 sm:$0xff]   ;;  %v4645_v34 = vld [vmem:[%s6509_s1 + $0xac] ss:$16 sps:$4 sm:$0xff]  }
  0x28   : > { %v4606_v3 = vld [vmem:[%s6509_s1 + $0x404] ss:$16 sps:$4 sm:$0xff]   ;;  %v5334_v5 = vld [vmem:[%s5263_s9] ss:$28 sps:$4 sm:$0xff]   ;;  %v5408_v31 = vld [vmem:[%s5263_s9 + $0x70] ss:$28 sps:$4 sm:$0xff]  }
  0x29   : > { %1964 = vmatpush1.bf16.msra.mxu1 %v4554_v35  ;;  %v4601_v6 = vld [vmem:[%s5263_s9 + $0x8] ss:$28 sps:$4 sm:$0xff]   ;;  %v4604_v7 = vld [vmem:[%s6509_s1 + $0x400] ss:$16 sps:$4 sm:$0xff]   ;;  %v4651_v32 = vld [vmem:[%s5263_s9 + $0x78] ss:$28 sps:$4 sm:$0xff]  }
  0x2a   : > { %2065 = vmatpush1.bf16.msra.mxu0 %v4555_v36  ;;  %1965 = vmatprep.subr.bf16.mxu1 %v4556_v37  ;;  %v4612_v9 = vld [vmem:[%s6509_s1 + $0x424] ss:$16 sps:$4 sm:$0xff]   ;;  %v4610_v13 = vld [vmem:[%s6509_s1 + $0x420] ss:$16 sps:$4 sm:$0xff]   ;;  %v5418_v35 = vld [vmem:[%s5263_s9 + $0xac] ss:$28 sps:$4 sm:$0xff]  }
  0x2b   : > { %2066 = vmatprep.subr.bf16.mxu0 %v4558_v38  ;;  %v4631_v12 = vld [vmem:[%s5263_s9 + $0x44] ss:$28 sps:$4 sm:$0xff]   ;;  %v5384_v23 = vld [vmem:[%s5263_s9 + $0x74] ss:$28 sps:$4 sm:$0xff]   ;;  %v4643_v38 = vld [vmem:[%s6509_s1 + $0xa8] ss:$16 sps:$4 sm:$0xff]  }
  0x2c   : > { %v4618_v15 = vld [vmem:[%s6509_s1 + $0x444] ss:$16 sps:$4 sm:$0xff]   ;;  %v4616_v17 = vld [vmem:[%s6509_s1 + $0x440] ss:$16 sps:$4 sm:$0xff]  }
  0x2d   : > { %1966 = vmatpush1.bf16.msra.mxu1 %v4560_v39  ;;  %v4633_v20 = vld [vmem:[%s5263_s9 + $0x40] ss:$28 sps:$4 sm:$0xff]   ;;  %v4624_v21 = vld [vmem:[%s6509_s1 + $0x464] ss:$16 sps:$4 sm:$0xff]  }
  0x2e   : > { %2067 = vmatpush1.bf16.msra.mxu0 %v4561_v40  ;;  %1967 = vmatprep.subr.bf16.mxu1 %v4562_v41  ;;  %v4622_v25 = vld [vmem:[%s6509_s1 + $0x460] ss:$16 sps:$4 sm:$0xff]   ;;  %v4636_v27 = vld [vmem:[%s6509_s1 + $0x484] ss:$16 sps:$4 sm:$0xff]   ;;  %v4657_v40 = vld [vmem:[%s6509_s1 + $0xcc] ss:$16 sps:$4 sm:$0xff]  }
  0x2f   : > { %2068 = vmatprep.subr.bf16.mxu0 %v4564_v42  ;;  %v4634_v29 = vld [vmem:[%s6509_s1 + $0x480] ss:$16 sps:$4 sm:$0xff]   ;;  %v4642_v33 = vld [vmem:[%s6509_s1 + $0x4a4] ss:$16 sps:$4 sm:$0xff]   ;;  %v4655_v42 = vld [vmem:[%s6509_s1 + $0xc8] ss:$16 sps:$4 sm:$0xff]  }
  0x30   : > { %v4667_v36 = vld [vmem:[%s5263_s9 + $0xb4] ss:$28 sps:$4 sm:$0xff]  }
  0x31   : > { %1968 = vmatpush1.bf16.msra.mxu1 %v4566_v43  ;;  %v4640_v37 = vld [vmem:[%s6509_s1 + $0x4a0] ss:$16 sps:$4 sm:$0xff]   ;;  %v4654_v39 = vld [vmem:[%s6509_s1 + $0x4c4] ss:$16 sps:$4 sm:$0xff]  }
  0x32   : > { %2069 = vmatpush1.bf16.msra.mxu0 %v4567_v44  ;;  %1969 = vmatprep.subr.bf16.mxu1 %v4568_v45  ;;  %v4652_v41 = vld [vmem:[%s6509_s1 + $0x4c0] ss:$16 sps:$4 sm:$0xff]   ;;  %v5442_v43 = vld [vmem:[%s5263_s9 + $0xa8] ss:$28 sps:$4 sm:$0xff]  }
  0x33   : > { %2070 = vmatprep.subr.bf16.mxu0 %v4570_v46  ;;  %v5445_v44 = vld [vmem:[%s5263_s9 + $0xb0] ss:$28 sps:$4 sm:$0xff]   ;;  %v4660_v45 = vld [vmem:[%s6509_s1 + $0x4e4] ss:$16 sps:$4 sm:$0xff]  }
  0x34   : > { %v4663_v46 = vld [vmem:[%s6509_s1 + $0xec] ss:$16 sps:$4 sm:$0xff]   ;;  %v4672_v52 = vld [vmem:[%s6509_s1 + $0x504] ss:$16 sps:$4 sm:$0xff]  }
  0x35   : > { %1970 = vmatpush1.bf16.msra.mxu1 %v4572_v47  ;;  %v5454_v47 = vld [vmem:[%s5263_s9 + $0xe4] ss:$28 sps:$4 sm:$0xff]  }
  0x36   : > { %2071 = vmatpush1.bf16.msra.mxu0 %v4573_v48  ;;  %1971 = vmatprep.subr.bf16.mxu1 %v4574_v49  ;;  %v5457_v48 = vld [vmem:[%s5263_s9 + $0xec] ss:$28 sps:$4 sm:$0xff]   ;;  %v4658_v49 = vld [vmem:[%s6509_s1 + $0x4e0] ss:$16 sps:$4 sm:$0xff]  }
  0x37   : > { %2072 = vmatprep.subr.bf16.mxu0 %v4576_v51  ;;  %v4661_v51 = vld [vmem:[%s6509_s1 + $0xe8] ss:$16 sps:$4 sm:$0xff]  }
  0x39   : > { %1972 = vmatpush1.bf16.msra.mxu1 %v4578_v53  ;;  %v4675_v53 = vld [vmem:[%s6509_s1 + $0x10c] ss:$16 sps:$4 sm:$0xff]  }
  0x3a   : > { %2073 = vmatpush1.bf16.msra.mxu0 %v4579_v54  ;;  %1973 = vmatprep.subr.bf16.mxu1 %v4580_v55  ;;  %v4670_v54 = vld [vmem:[%s6509_s1 + $0x500] ss:$16 sps:$4 sm:$0xff]  }
  0x3b   : > { %2074 = vmatprep.subr.bf16.mxu0 %v4582_v56  ;;  %v5479_v55 = vld [vmem:[%s5263_s9 + $0xe0] ss:$28 sps:$4 sm:$0xff]   ;;  %v5482_v56 = vld [vmem:[%s5263_s9 + $0xe8] ss:$28 sps:$4 sm:$0xff]  }
  0x3d   : > { %1974 = vmatpush1.bf16.msra.mxu1 %v4584_v57  ;;  %v4673_v57 = vld [vmem:[%s6509_s1 + $0x108] ss:$16 sps:$4 sm:$0xff]  }
  0x3e   : > { %2075 = vmatpush1.bf16.msra.mxu0 %v4585_v58  ;;  %1975 = vmatprep.subr.bf16.mxu1 %v4586_v59  ;;  %v4678_v58 = vld [vmem:[%s6509_s1 + $0x524] ss:$16 sps:$4 sm:$0xff]   ;;  %v4681_v59 = vld [vmem:[%s6509_s1 + $0x12c] ss:$16 sps:$4 sm:$0xff]  }
  0x3f   : > { %2076 = vmatprep.subr.bf16.mxu0 %v4588_v60  ;;  %v5494_v60 = vld [vmem:[%s5263_s9 + $0x11c] ss:$28 sps:$4 sm:$0xff]  }
  0x41   : > { %1976 = vmatpush1.bf16.msra.mxu1 %v4590_v61  ;;  %v4676_v61 = vld [vmem:[%s6509_s1 + $0x520] ss:$16 sps:$4 sm:$0xff]  }
  0x42   : > { %2077 = vmatpush1.bf16.msra.mxu0 %v4591_v62  ;;  %1977 = vmatprep.subr.bf16.mxu1 %v4592_v63  ;;  %v5500_v62 = vld [vmem:[%s5263_s9 + $0x124] ss:$28 sps:$4 sm:$0xff]   ;;  %v4679_v63 = vld [vmem:[%s6509_s1 + $0x128] ss:$16 sps:$4 sm:$0xff]  }
  0x43   : > { %2078 = vmatprep.subr.bf16.mxu0 %v4594_v0  ;;  %v4690_v0 = vld [vmem:[%s6509_s1 + $0x544] ss:$16 sps:$4 sm:$0xff]  }
  0x45   : > { %1978 = vmatpush1.bf16.msra.mxu1 %v4596_v1  ;;  %v4693_v1 = vld [vmem:[%s6509_s1 + $0x14c] ss:$16 sps:$4 sm:$0xff]  }
  0x46   : > { %2079 = vmatpush1.bf16.msra.mxu0 %v4597_v2  ;;  %2351 = vmatprep.subr.bf16.mxu1 %v4609_v4  ;;  %v5514_v2 = vld [vmem:[%s5263_s9 + $0x118] ss:$28 sps:$4 sm:$0xff]  }
  0x47   : > { %2149 = vmatprep.subr.bf16.mxu0 %v4606_v3  ;;  %v5517_v3 = vld [vmem:[%s5263_s9 + $0x120] ss:$28 sps:$4 sm:$0xff]   ;;  %v336_v4 = vld [vmem:[%s5263_s9 + $0x150] sm:$0xff] }
  0x48   : > { %1980 = vmatmul.mubr.bf16.vlgmr.msra.gmra.mrb[0].mxu1 %v5334_v5 }
  0x49   : > { %2081 = vmatmul.mubr.bf16.vlgmr.msra.gmra.mrb[0].mxu0 %v4601_v6  ;;  %2352 = vmatpush1.bf16.msra.mxu1 %v4607_v8  ;;  %v337_v6 = vld [vmem:[%s5263_s9 + $0x158] sm:$0xff] }
  0x4a   : > { %2150 = vmatpush1.bf16.msra.mxu0 %v4604_v7  ;;  %2353 = vmatprep.subr.bf16.mxu1 %v4615_v10  ;;  %v4688_v7 = vld [vmem:[%s6509_s1 + $0x540] ss:$16 sps:$4 sm:$0xff]   ;;  %v4691_v8 = vld [vmem:[%s6509_s1 + $0x148] ss:$16 sps:$4 sm:$0xff]   ;;  %v4699_v10 = vld [vmem:[%s6509_s1 + $0x16c] ss:$16 sps:$4 sm:$0xff]  }
  0x4b   : > { %2151 = vmatprep.subr.bf16.mxu0 %v4612_v9  ;;  %1989 = vmatprep.mubr.bf16.mxu1 %v5350_v11  ;;  %v4696_v9 = vld [vmem:[%s6509_s1 + $0x564] ss:$16 sps:$4 sm:$0xff]  }
  0x4c   : > { %2090 = vmatprep.mubr.bf16.mxu0 %v4631_v12  ;;  %v5535_v12 = vcombine.high %v336_v4, %v336_v4 }
  0x4d   : > { %2354 = vmatpush1.bf16.msra.mxu1 %v4613_v14  ;;  %v4694_v14 = vld [vmem:[%s6509_s1 + $0x560] ss:$16 sps:$4 sm:$0xff]  }
  0x4e   : > { %2152 = vmatpush1.bf16.msra.mxu0 %v4610_v13  ;;  %2355 = vmatprep.subr.bf16.mxu1 %v4621_v16  ;;  %v5537_v13 = vcombine.high %v337_v6, %v337_v6  ;;  %v4708_v16 = vld [vmem:[%s6509_s1 + $0x584] ss:$16 sps:$4 sm:$0xff]  }
  0x4f   : > { %2153 = vmatprep.subr.bf16.mxu0 %v4618_v15  ;;  %v4697_v15 = vld [vmem:[%s6509_s1 + $0x168] ss:$16 sps:$4 sm:$0xff]  }
  0x50   : > { %1990 = vmatmul.mubr.bf16.gmra.mrb[4].mxu1 %v5374_v19 }
  0x51   : > { %2091 = vmatmul.mubr.bf16.gmra.mrb[4].mxu0 %v4633_v20  ;;  %2356 = vmatpush1.bf16.msra.mxu1 %v4619_v18  ;;  %v5555_v18 = vcombine.low %v336_v4, %v336_v4  ;;  %v5557_v20 = vcombine.low %v337_v6, %v337_v6  ;;  %v5683_v4 = vld [vmem:[%s5263_s9 + $0xbc] ss:$28 sps:$4 sm:$0xff]  }
  0x52   : > { %2154 = vmatpush1.bf16.msra.mxu0 %v4616_v17  ;;  %2357 = vmatprep.subr.bf16.mxu1 %v4627_v22  ;;  %v4711_v17 = vld [vmem:[%s6509_s1 + $0x18c] ss:$16 sps:$4 sm:$0xff]   ;;  %v4709_v22 = vld [vmem:[%s6509_s1 + $0x188] ss:$16 sps:$4 sm:$0xff]  }
  0x53   : > { %2155 = vmatprep.subr.bf16.mxu0 %v4624_v21  ;;  %1999 = vmatprep.mubr.bf16.mxu1 %v5384_v23  ;;  %v4706_v21 = vld [vmem:[%s6509_s1 + $0x580] ss:$16 sps:$4 sm:$0xff]   ;;  %v4760_v6 = vld [vmem:[%s6509_s1 + $0x2ac] ss:$16 sps:$4 sm:$0xff]  }
  0x54   : > { %2100 = vmatprep.mubr.bf16.mxu0 %v4649_v24  ;;  %v4714_v24 = vld [vmem:[%s6509_s1 + $0x5a4] ss:$16 sps:$4 sm:$0xff]  }
  0x55   : > { %2358 = vmatpush1.bf16.msra.mxu1 %v4625_v26  ;;  %v5572_v26 = vld [vmem:[%s5263_s9 + $0x14] ss:$28 sps:$4 sm:$0xff]  }
  0x56   : > { %2156 = vmatpush1.bf16.msra.mxu0 %v4622_v25  ;;  %2359 = vmatprep.subr.bf16.mxu1 %v4639_v28  ;;  %v4717_v25 = vld [vmem:[%s6509_s1 + $0x1ac] ss:$16 sps:$4 sm:$0xff]   ;;  %v4715_v28 = vld [vmem:[%s6509_s1 + $0x1a8] ss:$16 sps:$4 sm:$0xff]  }
  0x57   : > { %2157 = vmatprep.subr.bf16.mxu0 %v4636_v27  ;;  %v4712_v27 = vld [vmem:[%s6509_s1 + $0x5a0] ss:$16 sps:$4 sm:$0xff]  }
  0x58   : > { %2000 = vmatmul.mubr.bf16.gmra.mrb[8].mxu1 %v5408_v31 }
  0x59   : > { %2101 = vmatmul.mubr.bf16.gmra.mrb[8].mxu0 %v4651_v32  ;;  %2360 = vmatpush1.bf16.msra.mxu1 %v4637_v30  ;;  %v4727_v30 = vld [vmem:[%s6509_s1 + $0x1cc] ss:$16 sps:$4 sm:$0xff]   ;;  %v4722_v32 = vld [vmem:[%s6509_s1 + $0x5c0] ss:$16 sps:$4 sm:$0xff]  }
  0x5a   : > { %2158 = vmatpush1.bf16.msra.mxu0 %v4634_v29  ;;  %2361 = vmatprep.subr.bf16.mxu1 %v4645_v34  ;;  %v4724_v29 = vld [vmem:[%s6509_s1 + $0x5c4] ss:$16 sps:$4 sm:$0xff]  }
  0x5b   : > { %2159 = vmatprep.subr.bf16.mxu0 %v4642_v33  ;;  %2009 = vmatprep.mubr.bf16.mxu1 %v5418_v35  ;;  %v4725_v33 = vld [vmem:[%s6509_s1 + $0x1c8] ss:$16 sps:$4 sm:$0xff]   ;;  %v4730_v34 = vld [vmem:[%s6509_s1 + $0x5e4] ss:$16 sps:$4 sm:$0xff]  }
  0x5c   : > { %2110 = vmatprep.mubr.bf16.mxu0 %v4667_v36  ;;  %v4728_v36 = vld [vmem:[%s6509_s1 + $0x5e0] ss:$16 sps:$4 sm:$0xff]  }
  0x5d   : > { %2362 = vmatpush1.bf16.msra.mxu1 %v4643_v38  ;;  %v4739_v38 = vld [vmem:[%s6509_s1 + $0x20c] ss:$16 sps:$4 sm:$0xff]  }
  0x5e   : > { %2160 = vmatpush1.bf16.msra.mxu0 %v4640_v37  ;;  %2363 = vmatprep.subr.bf16.mxu1 %v4657_v40  ;;  %v4731_v37 = vld [vmem:[%s6509_s1 + $0x1e8] ss:$16 sps:$4 sm:$0xff]   ;;  %v5615_v40 = vld [vmem:[%s5263_s9 + $0x10] ss:$28 sps:$4 sm:$0xff]  }
  0x5f   : > { %2161 = vmatprep.subr.bf16.mxu0 %v4654_v39  ;;  %v4766_v39 = vld [vmem:[%s6509_s1 + $0x604] ss:$16 sps:$4 sm:$0xff]  }
  0x60   : > { %2010 = vmatmul.mubr.bf16.gmra.mrb[12].mxu1 %v5442_v43 }
  0x61   : > { %2111 = vmatmul.mubr.bf16.gmra.mrb[12].mxu0 %v5445_v44  ;;  %2364 = vmatpush1.bf16.msra.mxu1 %v4655_v42  ;;  %v5621_v42 = vld [vmem:[%s5263_s9 + $0x4c] ss:$28 sps:$4 sm:$0xff]  }
  0x62   : > { %2162 = vmatpush1.bf16.msra.mxu0 %v4652_v41  ;;  %2365 = vmatprep.subr.bf16.mxu1 %v4663_v46  ;;  %v4737_v41 = vld [vmem:[%s6509_s1 + $0x208] ss:$16 sps:$4 sm:$0xff]   ;;  %v4764_v46 = vld [vmem:[%s6509_s1 + $0x600] ss:$16 sps:$4 sm:$0xff]  }
  0x63   : > { %2163 = vmatprep.subr.bf16.mxu0 %v4660_v45  ;;  %2019 = vmatprep.mubr.bf16.mxu1 %v5454_v47  ;;  %v4742_v45 = vld [vmem:[%s6509_s1 + $0x22c] ss:$16 sps:$4 sm:$0xff]  }
  0x64   : > { %2120 = vmatprep.mubr.bf16.mxu0 %v5457_v48 }
  0x65   : > { %2366 = vmatpush1.bf16.msra.mxu1 %v4661_v51  ;;  %v4740_v51 = vld [vmem:[%s6509_s1 + $0x228] ss:$16 sps:$4 sm:$0xff]  }
  0x66   : > { %2164 = vmatpush1.bf16.msra.mxu0 %v4658_v49  ;;  %2367 = vmatprep.subr.bf16.mxu1 %v4675_v53  ;;  %v4772_v49 = vld [vmem:[%s6509_s1 + $0x624] ss:$16 sps:$4 sm:$0xff]  }
  0x67   : > { %2165 = vmatprep.subr.bf16.mxu0 %v4672_v52  ;;  %v4748_v52 = vld [vmem:[%s6509_s1 + $0x24c] ss:$16 sps:$4 sm:$0xff]   ;;  %v5646_v53 = vld [vmem:[%s5263_s9 + $0x48] ss:$28 sps:$4 sm:$0xff]  }
  0x68   : > { %2020 = vmatmul.mubr.bf16.gmra.mrb[16].mxu1 %v5479_v55 }
  0x69   : > { %2121 = vmatmul.mubr.bf16.gmra.mrb[16].mxu0 %v5482_v56  ;;  %2368 = vmatpush1.bf16.msra.mxu1 %v4673_v57  ;;  %v5652_v57 = vld [vmem:[%s5263_s9 + $0x84] ss:$28 sps:$4 sm:$0xff]  }
  0x6a   : > { %2166 = vmatpush1.bf16.msra.mxu0 %v4670_v54  ;;  %2369 = vmatprep.subr.bf16.mxu1 %v4681_v59  ;;  %v4746_v54 = vld [vmem:[%s6509_s1 + $0x248] ss:$16 sps:$4 sm:$0xff]  }
  0x6b   : > { %2167 = vmatprep.subr.bf16.mxu0 %v4678_v58  ;;  %2029 = vmatprep.mubr.bf16.mxu1 %v5494_v60  ;;  %v4781_v58 = vld [vmem:[%s6509_s1 + $0x644] ss:$16 sps:$4 sm:$0xff]   ;;  %v4749_v59 = vld [vmem:[%s6509_s1 + $0x268] ss:$16 sps:$4 sm:$0xff]  }
  0x6c   : > { %2130 = vmatprep.mubr.bf16.mxu0 %v5500_v62 }
  0x6d   : > { %2370 = vmatpush1.bf16.msra.mxu1 %v4679_v63  ;;  %v4787_v63 = vld [vmem:[%s6509_s1 + $0x664] ss:$16 sps:$4 sm:$0xff]  }
  0x6e   : > { %2168 = vmatpush1.bf16.msra.mxu0 %v4676_v61  ;;  %2371 = vmatprep.subr.bf16.mxu1 %v4693_v1  ;;  %v4779_v61 = vld [vmem:[%s6509_s1 + $0x640] ss:$16 sps:$4 sm:$0xff]  }
  0x6f   : > { %2169 = vmatprep.subr.bf16.mxu0 %v4690_v0  ;;  %v4757_v0 = vld [vmem:[%s6509_s1 + $0x28c] ss:$16 sps:$4 sm:$0xff]  }
  0x70   : > { %2030 = vmatmul.mubr.bf16.gmra.mrb[20].mxu1 %v5514_v2  ;;  %v5677_v1 = vld [vmem:[%s5263_s9 + $0x80] ss:$28 sps:$4 sm:$0xff]  }
  0x71   : > { %2131 = vmatmul.mubr.bf16.gmra.mrb[20].mxu0 %v5517_v3  ;;  %2372 = vmatpush1.bf16.msra.mxu1 %v4691_v8  ;;  %v4758_v8 = vld [vmem:[%s6509_s1 + $0x2a8] ss:$16 sps:$4 sm:$0xff]  }
  0x72   : > { %2170 = vmatpush1.bf16.msra.mxu0 %v4688_v7  ;;  %2373 = vmatprep.subr.bf16.mxu1 %v4699_v10  ;;  %v4796_v7 = vld [vmem:[%s6509_s1 + $0x684] ss:$16 sps:$4 sm:$0xff]  }
  0x73   : > { %2171 = vmatprep.subr.bf16.mxu0 %v4696_v9  ;;  %2039 = vmatprep.mubr.bf16.mxu1 %v5535_v12  ;;  %v4769_v9 = vld [vmem:[%s6509_s1 + $0x2cc] ss:$16 sps:$4 sm:$0xff]   ;;  %v5708_v10 = vld [vmem:[%s5263_s9 + $0xb8] ss:$28 sps:$4 sm:$0xff]  }
  0x74   : > { %2140 = vmatprep.mubr.bf16.mxu0 %v5537_v13 }
  0x75   : > { %2374 = vmatpush1.bf16.msra.mxu1 %v4697_v15  ;;  %v5714_v15 = vld [vmem:[%s5263_s9 + $0xf4] ss:$28 sps:$4 sm:$0xff]  }
  0x76   : > { %2172 = vmatpush1.bf16.msra.mxu0 %v4694_v14  ;;  %2375 = vmatprep.subr.bf16.mxu1 %v4711_v17  ;;  %v4767_v14 = vld [vmem:[%s6509_s1 + $0x2c8] ss:$16 sps:$4 sm:$0xff]   ;;  %v4800_v17 = vld [vmem:[%s6509_s1 + $0x6a0] ss:$16 sps:$4 sm:$0xff]  }
  0x77   : > { %2173 = vmatprep.subr.bf16.mxu0 %v4708_v16  ;;  %v4802_v16 = vld [vmem:[%s6509_s1 + $0x6a4] ss:$16 sps:$4 sm:$0xff]  }
  0x78   : > { %2040 = vmatmul.mubr.bf16.gmra.mrb[24].mxu1 %v5555_v18 }
  0x79   : > { %2141 = vmatmul.mubr.bf16.gmra.mrb[24].mxu0 %v5557_v20  ;;  %2376 = vmatpush1.bf16.msra.mxu1 %v4709_v22  ;;  %v4810_v22 = vld [vmem:[%s6509_s1 + $0x6c4] ss:$16 sps:$4 sm:$0xff]  }
  0x7a   : > { %2174 = vmatpush1.bf16.msra.mxu0 %v4706_v21  ;;  %2377 = vmatprep.subr.bf16.mxu1 %v4717_v25  ;;  %v4773_v21 = vld [vmem:[%s6509_s1 + $0x2e8] ss:$16 sps:$4 sm:$0xff]  }
  0x7b   : > { %2175 = vmatprep.subr.bf16.mxu0 %v4714_v24  ;;  %2181 = vmatprep.mubr.bf16.mxu0 %v5572_v26  ;;  %v5739_v24 = vld [vmem:[%s5263_s9 + $0xf0] ss:$28 sps:$4 sm:$0xff]   ;;  %v4782_v25 = vld [vmem:[%s6509_s1 + $0x308] ss:$16 sps:$4 sm:$0xff]  }
  0x7c   : > { %2383 = vmatprep.mubr.bf16.mxu1 %v5278_v50  ;;  %v4733_v50 = vld [vmem:[%s6509_s1 + $0x1ec] ss:$16 sps:$4 sm:$0xff]  }
  0x7d   : > { %2378 = vmatpush1.bf16.msra.mxu1 %v4715_v28  ;;  %v4790_v28 = vld [vmem:[%s6509_s1 + $0x32c] ss:$16 sps:$4 sm:$0xff]  }
  0x7e   : > { %2176 = vmatpush1.bf16.msra.mxu0 %v4712_v27  ;;  %2379 = vmatprep.subr.bf16.mxu1 %v4727_v30  ;;  %v5745_v27 = vld [vmem:[%s5263_s9 + $0x12c] ss:$28 sps:$4 sm:$0xff]  }
  0x7f   : > { %2177 = vmatprep.subr.bf16.mxu0 %v4724_v29  ;;  %v4816_v29 = vld [vmem:[%s6509_s1 + $0x6e4] ss:$16 sps:$4 sm:$0xff]   ;;  %v4788_v30 = vld [vmem:[%s6509_s1 + $0x328] ss:$16 sps:$4 sm:$0xff]  }
  0x81   : > { %2380 = vmatpush1.bf16.msra.mxu1 %v4725_v33  ;;  %v338_v33 = vld [vmem:[%s5263_s9 + $0x160] sm:$0xff] }
  0x82   : > { %2178 = vmatpush1.bf16.msra.mxu0 %v4722_v32  ;;  %2381 = vmatprep.subr.bf16.mxu1 %v4733_v50  ;;  %v4799_v32 = vld [vmem:[%s6509_s1 + $0x34c] ss:$16 sps:$4 sm:$0xff]   ;;  %v4797_v50 = vld [vmem:[%s6509_s1 + $0x348] ss:$16 sps:$4 sm:$0xff]  }
  0x83   : > { %2179 = vmatprep.subr.bf16.mxu0 %v4730_v34  ;;  %v5771_v34 = vld [vmem:[%s5263_s9 + $0x128] ss:$28 sps:$4 sm:$0xff]  }
  0x85   : > { %2382 = vmatpush1.bf16.msra.mxu1 %v4731_v37  ;;  %v4803_v37 = vld [vmem:[%s6509_s1 + $0x368] ss:$16 sps:$4 sm:$0xff]  }
  0x86   : > { %2180 = vmatpush1.bf16.msra.mxu0 %v4728_v36  ;;  %2452 = vmatprep.subr.bf16.mxu1 %v4739_v38  ;;  %v5776_v36 = vcombine.high %v338_v33, %v338_v33  ;;  %v4813_v38 = vld [vmem:[%s6509_s1 + $0x38c] ss:$16 sps:$4 sm:$0xff]  }
  0x87   : > { %2250 = vmatprep.subr.bf16.mxu0 %v4766_v39  ;;  %v5791_v39 = vcombine.low %v338_v33, %v338_v33  ;;  %v4908_v33 = vld [vmem:[%s6511_s3 + $0x10] ss:$8 sps:$4 sm:$0xff]  }
  0x88   : > { %2384 = vmatmul.mubr.bf16.vlgmr.msra.gmra.mrb[28].mxu1 %v5334_v5  ;;  %v4770_v5 = vld [vmem:[%s6509_s1 + $0x620] ss:$16 sps:$4 sm:$0xff]  }
  0x89   : > { %2182 = vmatmul.mubr.bf16.vlgmr.msra.gmra.mrb[0].mxu0 %v5615_v40  ;;  %2453 = vmatpush1.bf16.msra.mxu1 %v4737_v41  ;;  %v4819_v41 = vld [vmem:[%s6509_s1 + $0x3ac] ss:$16 sps:$4 sm:$0xff]  }
  0x8a   : > { %2191 = vmatprep.mubr.bf16.mxu0 %v5621_v42  ;;  %2454 = vmatprep.subr.bf16.mxu1 %v4742_v45  ;;  %v5068_v45 = vmov 0  }
  0x8b   : > { %2393 = vmatprep.mubr.bf16.mxu1 %v5350_v11  ;;  %2251 = vmatpush1.bf16.msra.mxu0 %v4764_v46  ;;  %v4751_v11 = vld [vmem:[%s6509_s1 + $0x26c] ss:$16 sps:$4 sm:$0xff]   ;;  %v5806_v46 = vld [vmem:[%s5263_s9 + $0x18] ss:$28 sps:$4 sm:$0xff]  }
  0x8c   : > { %2252 = vmatprep.subr.bf16.mxu0 %v4772_v49  ;;  %v4823_v49 = vld [vmem:[%s6509_s1 + $0x3cc] ss:$16 sps:$4 sm:$0xff]  }
  0x8d   : > { %2455 = vmatpush1.bf16.msra.mxu1 %v4740_v51  ;;  %v5053_v51 = vld [vmem:[%s5263_s9 + $0xc] ss:$28 sps:$4 sm:$0xff]  }
  0x8e   : > { %2456 = vmatprep.subr.bf16.mxu1 %v4748_v52  ;;  %v4826_v52 = vld [vmem:[%s6509_s1 + $0x3ec] ss:$16 sps:$4 sm:$0xff]  }
  0x8f   : > { %2253 = vmatpush1.bf16.msra.mxu0 %v4770_v5  ;;  %v4824_v5 = vld [vmem:[%s6509_s1 + $0x3e8] ss:$16 sps:$4 sm:$0xff]  }
  0x90   : > { %2394 = vmatmul.mubr.bf16.gmra.mrb[32].mxu1 %v5374_v19  ;;  %2254 = vmatprep.subr.bf16.mxu0 %v4781_v58  ;;  %v4755_v19 = vld [vmem:[%s6509_s1 + $0x288] ss:$16 sps:$4 sm:$0xff]  }
  0x91   : > { %2192 = vmatmul.mubr.bf16.gmra.mrb[4].mxu0 %v5646_v53  ;;  %2457 = vmatpush1.bf16.msra.mxu1 %v4746_v54  ;;  %v4830_v54 = vld [vmem:[%s6509_s1 + $0x40c] ss:$16 sps:$4 sm:$0xff]   ;;  %v4828_v58 = vld [vmem:[%s6509_s1 + $0x408] ss:$16 sps:$4 sm:$0xff]  }
  0x92   : > { %2201 = vmatprep.mubr.bf16.mxu0 %v5652_v57  ;;  %2458 = vmatprep.subr.bf16.mxu1 %v4751_v11  ;;  %v5827_v11 = vld [vmem:[%s5263_s9 + $0x50] ss:$28 sps:$4 sm:$0xff]  }
  0x93   : > { %2403 = vmatprep.mubr.bf16.mxu1 %v5384_v23  ;;  %2255 = vmatpush1.bf16.msra.mxu0 %v4779_v61  ;;  %v4785_v23 = vld [vmem:[%s6509_s1 + $0x660] ss:$16 sps:$4 sm:$0xff]   ;;  %v4831_v61 = vld [vmem:[%s6509_s1 + $0x428] ss:$16 sps:$4 sm:$0xff]  }
  0x94   : > { %2256 = vmatprep.subr.bf16.mxu0 %v4787_v63  ;;  %v5054_v63 = vld [vmem:[%s5263_s9 + $0x8] ss:$28 sps:$4 sm:$0xff]  }
  0x95   : > { %2459 = vmatpush1.bf16.msra.mxu1 %v4749_v59  ;;  %v4833_v59 = vld [vmem:[%s6509_s1 + $0x42c] ss:$16 sps:$4 sm:$0xff]  }
  0x96   : > { %2460 = vmatprep.subr.bf16.mxu1 %v4757_v0  ;;  %v4837_v0 = vld [vmem:[%s6509_s1 + $0x44c] ss:$16 sps:$4 sm:$0xff]  }
  0x97   : > { %2257 = vmatpush1.bf16.msra.mxu0 %v4785_v23  ;;  %v4835_v23 = vld [vmem:[%s6509_s1 + $0x448] ss:$16 sps:$4 sm:$0xff]  }
  0x98   : > { %2404 = vmatmul.mubr.bf16.gmra.mrb[36].mxu1 %v5408_v31  ;;  %v4794_v31 = vld [vmem:[%s6509_s1 + $0x680] ss:$16 sps:$4 sm:$0xff]   ;;  %2258 = vmatprep.subr.bf16.mxu0 %v4796_v7  ;;  %v4840_v7 = vld [vmem:[%s6509_s1 + $0x46c] ss:$16 sps:$4 sm:$0xff]  }
  0x99   : > { %2202 = vmatmul.mubr.bf16.gmra.mrb[8].mxu0 %v5677_v1  ;;  %2461 = vmatpush1.bf16.msra.mxu1 %v4755_v19  ;;  %v5845_v19 = vld [vmem:[%s5263_s9 + $0x88] ss:$28 sps:$4 sm:$0xff]  }
  0x9a   : > { %2211 = vmatprep.mubr.bf16.mxu0 %v5683_v4  ;;  %2462 = vmatprep.subr.bf16.mxu1 %v4760_v6  ;;  %v5055_v6 = vld [vmem:[%s5263_s9 + $0x44] ss:$28 sps:$4 sm:$0xff]  }
  0x9b   : > { %2413 = vmatprep.mubr.bf16.mxu1 %v5418_v35  ;;  %v4775_v35 = vld [vmem:[%s6509_s1 + $0x2ec] ss:$16 sps:$4 sm:$0xff]   ;;  %2259 = vmatpush1.bf16.msra.mxu0 %v4794_v31 }
  0x9c   : > { %2260 = vmatprep.subr.bf16.mxu0 %v4802_v16  ;;  %v4844_v31 = vld [vmem:[%s6509_s1 + $0x48c] ss:$16 sps:$4 sm:$0xff]   ;;  %v4842_v16 = vld [vmem:[%s6509_s1 + $0x488] ss:$16 sps:$4 sm:$0xff]  }
  0x9d   : > { %2463 = vmatpush1.bf16.msra.mxu1 %v4758_v8  ;;  %v5056_v8 = vld [vmem:[%s5263_s9 + $0x40] ss:$28 sps:$4 sm:$0xff]  }
  0x9e   : > { %2464 = vmatprep.subr.bf16.mxu1 %v4769_v9  ;;  %v4838_v9 = vld [vmem:[%s6509_s1 + $0x468] ss:$16 sps:$4 sm:$0xff]  }
  0x9f   : > { %2261 = vmatpush1.bf16.msra.mxu0 %v4800_v17  ;;  %v4847_v17 = vld [vmem:[%s6509_s1 + $0x4ac] ss:$16 sps:$4 sm:$0xff]  }
  0xa0   : > { %2414 = vmatmul.mubr.bf16.gmra.mrb[40].mxu1 %v5442_v43  ;;  %v4784_v43 = vld [vmem:[%s6509_s1 + $0x30c] ss:$16 sps:$4 sm:$0xff]   ;;  %2262 = vmatprep.subr.bf16.mxu0 %v4810_v22  ;;  %v4845_v22 = vld [vmem:[%s6509_s1 + $0x4a8] ss:$16 sps:$4 sm:$0xff]  }
  0xa1   : > { %2212 = vmatmul.mubr.bf16.gmra.mrb[12].mxu0 %v5708_v10  ;;  %2465 = vmatpush1.bf16.msra.mxu1 %v4767_v14  ;;  %v5057_v14 = vld [vmem:[%s5263_s9 + $0x7c] ss:$28 sps:$4 sm:$0xff]  }
  0xa2   : > { %2221 = vmatprep.mubr.bf16.mxu0 %v5714_v15  ;;  %2466 = vmatprep.subr.bf16.mxu1 %v4775_v35  ;;  %v5865_v35 = vld [vmem:[%s5263_s9 + $0xc0] ss:$28 sps:$4 sm:$0xff]  }
  0xa3   : > { %2423 = vmatprep.mubr.bf16.mxu1 %v5454_v47  ;;  %v4808_v47 = vld [vmem:[%s6509_s1 + $0x6c0] ss:$16 sps:$4 sm:$0xff]  }
  0xa4   : > { %2263 = vmatpush1.bf16.msra.mxu0 %v4808_v47  ;;  %v5059_v47 = vld [vmem:[%s5263_s9 + $0xb4] ss:$28 sps:$4 sm:$0xff]  }
  0xa5   : > { %2467 = vmatpush1.bf16.msra.mxu1 %v4773_v21  ;;  %2264 = vmatprep.subr.bf16.mxu0 %v4816_v29  ;;  %v5058_v21 = vld [vmem:[%s5263_s9 + $0x78] ss:$28 sps:$4 sm:$0xff]  }
  0xa6   : > { %2468 = vmatprep.subr.bf16.mxu1 %v4784_v43  ;;  %v4905_v43 = vld [vmem:[%s6511_s3] ss:$8 sps:$4 sm:$0xff]   ;;  %v5890_v29 = vld [vmem:[%s5263_s9 + $0xf8] ss:$28 sps:$4 sm:$0xff]  }
  0xa8   : > { %2424 = vmatmul.mubr.bf16.gmra.mrb[44].mxu1 %v5479_v55  ;;  %v4814_v55 = vld [vmem:[%s6509_s1 + $0x6e0] ss:$16 sps:$4 sm:$0xff]  }
  0xa9   : > { %2222 = vmatmul.mubr.bf16.gmra.mrb[16].mxu0 %v5739_v24  ;;  %2469 = vmatpush1.bf16.msra.mxu1 %v4782_v25  ;;  %v4907_v25 = vld [vmem:[%s6511_s3 + $0x4] ss:$8 sps:$4 sm:$0xff]  }
  0xaa   : > { %2231 = vmatprep.mubr.bf16.mxu0 %v5745_v27  ;;  %2470 = vmatprep.subr.bf16.mxu1 %v4790_v28  ;;  %v4851_v28 = vld [vmem:[%s6509_s1 + $0x4cc] ss:$16 sps:$4 sm:$0xff]  }
  0xab   : > { %2433 = vmatprep.mubr.bf16.mxu1 %v5494_v60  ;;  %v4805_v60 = vld [vmem:[%s6509_s1 + $0x36c] ss:$16 sps:$4 sm:$0xff]   ;;  %2265 = vmatpush1.bf16.msra.mxu0 %v4814_v55 }
  0xac   : > { %3335 = vmatprep.subr.bf16.mxu0 %v4907_v25  ;;  %v4910_v55 = vld [vmem:[%s6511_s3 + $0x14] ss:$8 sps:$4 sm:$0xff]  }
  0xad   : > { %2471 = vmatpush1.bf16.msra.mxu1 %v4788_v30  ;;  %v4849_v30 = vld [vmem:[%s6509_s1 + $0x4c8] ss:$16 sps:$4 sm:$0xff]   ;;  %v4886_v25 = vld [vmem:[%s6509_s1 + $0x62c] ss:$16 sps:$4 sm:$0xff]  }
  0xae   : > { %2472 = vmatprep.subr.bf16.mxu1 %v4799_v32  ;;  %v4854_v32 = vld [vmem:[%s6509_s1 + $0x4ec] ss:$16 sps:$4 sm:$0xff]  }
  0xb0   : > { %2434 = vmatmul.mubr.bf16.gmra.mrb[48].mxu1 %v5514_v2  ;;  %v4811_v2 = vld [vmem:[%s6509_s1 + $0x388] ss:$16 sps:$4 sm:$0xff]  }
  0xb1   : > { %2232 = vmatmul.mubr.bf16.gmra.mrb[20].mxu0 %v5771_v34  ;;  %2473 = vmatpush1.bf16.msra.mxu1 %v4797_v50  ;;  %v4852_v50 = vld [vmem:[%s6509_s1 + $0x4e8] ss:$16 sps:$4 sm:$0xff]  }
  0xb2   : > { %2241 = vmatprep.mubr.bf16.mxu0 %v5776_v36  ;;  %2474 = vmatprep.subr.bf16.mxu1 %v4805_v60  ;;  %v4913_v60 = vld [vmem:[%s6511_s3 + $0x24] ss:$8 sps:$4 sm:$0xff]  }
  0xb3   : > { %2443 = vmatprep.mubr.bf16.mxu1 %v5535_v12  ;;  %v4817_v12 = vld [vmem:[%s6509_s1 + $0x3a8] ss:$16 sps:$4 sm:$0xff]  }
  0xb5   : > { %2475 = vmatpush1.bf16.msra.mxu1 %v4803_v37  ;;  %v5918_v37 = vld [vmem:[%s5263_s9 + $0x130] ss:$28 sps:$4 sm:$0xff]  }
  0xb6   : > { %2476 = vmatprep.subr.bf16.mxu1 %v4813_v38  ;;  %v4856_v38 = vld [vmem:[%s6509_s1 + $0x508] ss:$16 sps:$4 sm:$0xff]  }
  0xb8   : > { %2444 = vmatmul.mubr.bf16.gmra.mrb[52].mxu1 %v5555_v18  ;;  %v4821_v18 = vld [vmem:[%s6509_s1 + $0x3c8] ss:$16 sps:$4 sm:$0xff]  }
  0xb9   : > { %2242 = vmatmul.mubr.bf16.gmra.mrb[24].mxu0 %v5791_v39  ;;  %2477 = vmatpush1.bf16.msra.mxu1 %v4811_v2  ;;  %v4861_v2 = vld [vmem:[%s6509_s1 + $0x52c] ss:$16 sps:$4 sm:$0xff]  }
  0xba   : > { %2282 = vmatprep.mubr.bf16.mxu0 %v5068_v45  ;;  %2478 = vmatprep.subr.bf16.mxu1 %v4819_v41  ;;  %v4916_v41 = vld [vmem:[%s6511_s3 + $0x34] ss:$8 sps:$4 sm:$0xff]  }
  0xbb   : > { %2484 = vmatprep.mubr.bf16.mxu1 %v5053_v51  ;;  %v5946_v51 = vld [vmem:[%s5263_s9 + $0x168] ss:$0 sps:$4 sm:$0xff]  }
  0xbd   : > { %2479 = vmatpush1.bf16.msra.mxu1 %v4817_v12  ;;  %v4859_v12 = vld [vmem:[%s6509_s1 + $0x528] ss:$16 sps:$4 sm:$0xff]  }
  0xbe   : > { %2480 = vmatprep.subr.bf16.mxu1 %v4823_v49  ;;  %v4865_v49 = vld [vmem:[%s6509_s1 + $0x54c] ss:$16 sps:$4 sm:$0xff]  }
  0xc1   : > { %2283 = vmatmul.mubr.bf16.vlgmr.msra.gmra.mrb[0].mxu0 %v5806_v46  ;;  %2481 = vmatpush1.bf16.msra.mxu1 %v4821_v18  ;;  %v4863_v18 = vld [vmem:[%s6509_s1 + $0x548] ss:$16 sps:$4 sm:$0xff]  }
  0xc2   : > { %2292 = vmatprep.mubr.bf16.mxu0 %v5068_v45  ;;  %2482 = vmatprep.subr.bf16.mxu1 %v4826_v52  ;;  %v4868_v52 = vld [vmem:[%s6509_s1 + $0x56c] ss:$16 sps:$4 sm:$0xff]  }
  0xc3   : > { %3336 = vmatpush1.bf16.msra.mxu0 %v4905_v43  ;;  %v4881_v43 = vld [vmem:[%s6509_s1 + $0x608] ss:$16 sps:$4 sm:$0xff]  }
  0xc4   : > { %3337 = vmatprep.subr.bf16.mxu0 %v4910_v55  ;;  %v4892_v55 = vld [vmem:[%s6509_s1 + $0x66c] ss:$16 sps:$4 sm:$0xff]  }
  0xc5   : > { %2483 = vmatpush1.bf16.msra.mxu1 %v4824_v5  ;;  %v4917_v5 = vld [vmem:[%s6511_s3 + $0x40] ss:$8 sps:$4 sm:$0xff]  }
  0xc6   : > { %2553 = vmatprep.subr.bf16.mxu1 %v4830_v54  ;;  %v4922_v54 = vld [vmem:[%s6511_s3 + $0x54] ss:$8 sps:$4 sm:$0xff]  }
  0xc7   : > { %3338 = vmatpush1.bf16.msra.mxu0 %v4908_v33  ;;  %v4943_v33 = vld [vmem:[%s6511_s3 + $0xc4] ss:$8 sps:$4 sm:$0xff]  }
  0xc8   : > { %2485 = vmatmul.mubr.bf16.vlgmr.msra.gmra.mrb[28].mxu1 %v5054_v63  ;;  %3339 = vmatprep.subr.bf16.mxu0 %v4913_v60  ;;  %v4874_v63 = vld [vmem:[%s6509_s1 + $0x5ac] ss:$16 sps:$4 sm:$0xff]   ;;  %v4890_v60 = vld [vmem:[%s6509_s1 + $0x668] ss:$16 sps:$4 sm:$0xff]  }
  0xc9   : > { %2293 = vmatmul.mubr.bf16.gmra.mrb[4].mxu0 %v5827_v11  ;;  %2554 = vmatpush1.bf16.msra.mxu1 %v4828_v58  ;;  %v4866_v58 = vld [vmem:[%s6509_s1 + $0x568] ss:$16 sps:$4 sm:$0xff]  }
  0xca   : > { %2302 = vmatprep.mubr.bf16.mxu0 %v5068_v45  ;;  %2555 = vmatprep.subr.bf16.mxu1 %v4833_v59  ;;  %v4871_v59 = vld [vmem:[%s6509_s1 + $0x58c] ss:$16 sps:$4 sm:$0xff]  }
  0xcb   : > { %2494 = vmatprep.mubr.bf16.mxu1 %v5055_v6  ;;  %v4928_v6 = vld [vmem:[%s6511_s3 + $0x74] ss:$8 sps:$4 sm:$0xff]  }
  0xcd   : > { %2556 = vmatpush1.bf16.msra.mxu1 %v4831_v61  ;;  %v4925_v61 = vld [vmem:[%s6511_s3 + $0x64] ss:$8 sps:$4 sm:$0xff]  }
  0xce   : > { %2557 = vmatprep.subr.bf16.mxu1 %v4837_v0  ;;  %v4923_v0 = vld [vmem:[%s6511_s3 + $0x60] ss:$8 sps:$4 sm:$0xff]  }
  0xd0   : > { %2495 = vmatmul.mubr.bf16.gmra.mrb[32].mxu1 %v5056_v8  ;;  %v4931_v8 = vld [vmem:[%s6511_s3 + $0x84] ss:$8 sps:$4 sm:$0xff]  }
  0xd1   : > { %2303 = vmatmul.mubr.bf16.gmra.mrb[8].mxu0 %v5845_v19  ;;  %2558 = vmatpush1.bf16.msra.mxu1 %v4835_v23  ;;  %v4872_v23 = vld [vmem:[%s6509_s1 + $0x5a8] ss:$16 sps:$4 sm:$0xff]  }
  0xd2   : > { %2312 = vmatprep.mubr.bf16.mxu0 %v5068_v45  ;;  %2559 = vmatprep.subr.bf16.mxu1 %v4840_v7  ;;  %v4877_v7 = vld [vmem:[%s6509_s1 + $0x5cc] ss:$16 sps:$4 sm:$0xff]  }
  0xd3   : > { %2504 = vmatprep.mubr.bf16.mxu1 %v5057_v14  ;;  %v4934_v14 = vld [vmem:[%s6511_s3 + $0x94] ss:$8 sps:$4 sm:$0xff]  }
  0xd5   : > { %2560 = vmatpush1.bf16.msra.mxu1 %v4838_v9  ;;  %v4880_v9 = vld [vmem:[%s6509_s1 + $0x5ec] ss:$16 sps:$4 sm:$0xff]  }
  0xd6   : > { %2561 = vmatprep.subr.bf16.mxu1 %v4844_v31  ;;  %v4929_v31 = vld [vmem:[%s6511_s3 + $0x80] ss:$8 sps:$4 sm:$0xff]  }
  0xd8   : > { %2505 = vmatmul.mubr.bf16.gmra.mrb[36].mxu1 %v5058_v21  ;;  %v4932_v21 = vld [vmem:[%s6511_s3 + $0x90] ss:$8 sps:$4 sm:$0xff]  }
  0xd9   : > { %2313 = vmatmul.mubr.bf16.gmra.mrb[12].mxu0 %v5865_v35  ;;  %2562 = vmatpush1.bf16.msra.mxu1 %v4842_v16  ;;  %v4878_v16 = vld [vmem:[%s6509_s1 + $0x5e8] ss:$16 sps:$4 sm:$0xff]  }
  0xda   : > { %2322 = vmatprep.mubr.bf16.mxu0 %v5068_v45  ;;  %2563 = vmatprep.subr.bf16.mxu1 %v4847_v17  ;;  %v4883_v17 = vld [vmem:[%s6509_s1 + $0x60c] ss:$16 sps:$4 sm:$0xff]  }
  0xdb   : > { %2514 = vmatprep.mubr.bf16.mxu1 %v5059_v47  ;;  %v4940_v47 = vld [vmem:[%s6511_s3 + $0xb4] ss:$8 sps:$4 sm:$0xff]  }
  0xdd   : > { %2564 = vmatpush1.bf16.msra.mxu1 %v4845_v22  ;;  %v4937_v22 = vld [vmem:[%s6511_s3 + $0xa4] ss:$8 sps:$4 sm:$0xff]  }
  0xde   : > { %2565 = vmatprep.subr.bf16.mxu1 %v4851_v28  ;;  %v4935_v28 = vld [vmem:[%s6511_s3 + $0xa0] ss:$8 sps:$4 sm:$0xff]  }
  0xe0   : > { %2515 = vmatmul.mubr.bf16.gmra.mrb[40].mxu1 %v5445_v44  ;;  %v4858_v44 = vld [vmem:[%s6509_s1 + $0x50c] ss:$16 sps:$4 sm:$0xff]  }
  0xe1   : > { %2323 = vmatmul.mubr.bf16.gmra.mrb[16].mxu0 %v5890_v29  ;;  %2566 = vmatpush1.bf16.msra.mxu1 %v4849_v30  ;;  %v4884_v30 = vld [vmem:[%s6509_s1 + $0x628] ss:$16 sps:$4 sm:$0xff]  }
  0xe2   : > { %2332 = vmatprep.mubr.bf16.mxu0 %v5068_v45  ;;  %2567 = vmatprep.subr.bf16.mxu1 %v4854_v32  ;;  %v4889_v32 = vld [vmem:[%s6509_s1 + $0x64c] ss:$16 sps:$4 sm:$0xff]  }
  0xe3   : > { %2524 = vmatprep.mubr.bf16.mxu1 %v5457_v48  ;;  %v4911_v48 = vld [vmem:[%s6511_s3 + $0x20] ss:$8 sps:$4 sm:$0xff]  }
  0xe4   : > { %3340 = vmatpush1.bf16.msra.mxu0 %v4911_v48  ;;  %v4898_v48 = vld [vmem:[%s6509_s1 + $0x6ac] ss:$16 sps:$4 sm:$0xff]  }
  0xe5   : > { %2568 = vmatpush1.bf16.msra.mxu1 %v4852_v50  ;;  %3341 = vmatprep.subr.bf16.mxu0 %v4916_v41  ;;  %v4941_v50 = vld [vmem:[%s6511_s3 + $0xc0] ss:$8 sps:$4 sm:$0xff]  }
  0xe6   : > { %2569 = vmatprep.subr.bf16.mxu1 %v4858_v44  ;;  %v4946_v44 = vld [vmem:[%s6511_s3 + $0xd4] ss:$8 sps:$4 sm:$0xff]   ;;  %v4947_v41 = vld [vmem:[%s6511_s3 + $0xe0] ss:$8 sps:$4 sm:$0xff]  }
  0xe8   : > { %2525 = vmatmul.mubr.bf16.gmra.mrb[44].mxu1 %v5482_v56  ;;  %v4914_v56 = vld [vmem:[%s6511_s3 + $0x30] ss:$8 sps:$4 sm:$0xff]  }
  0xe9   : > { %2333 = vmatmul.mubr.bf16.gmra.mrb[20].mxu0 %v5918_v37  ;;  %2570 = vmatpush1.bf16.msra.mxu1 %v4856_v38  ;;  %v4895_v38 = vld [vmem:[%s6509_s1 + $0x68c] ss:$16 sps:$4 sm:$0xff]  }
  0xea   : > { %2342 = vmatprep.mubr.bf16.mxu0 %v5068_v45  ;;  %2571 = vmatprep.subr.bf16.mxu1 %v4861_v2  ;;  %v4949_v2 = vld [vmem:[%s6511_s3 + $0xe4] ss:$8 sps:$4 sm:$0xff]  }
  0xeb   : > { %2534 = vmatprep.mubr.bf16.mxu1 %v5500_v62  ;;  %v4919_v62 = vld [vmem:[%s6511_s3 + $0x44] ss:$8 sps:$4 sm:$0xff]   ;;  %3342 = vmatpush1.bf16.msra.mxu0 %v4914_v56 }
  0xec   : > { %3343 = vmatprep.subr.bf16.mxu0 %v4919_v62  ;;  %v4901_v56 = vld [vmem:[%s6509_s1 + $0x6cc] ss:$16 sps:$4 sm:$0xff]   ;;  %v4899_v62 = vld [vmem:[%s6509_s1 + $0x6c8] ss:$16 sps:$4 sm:$0xff]  }
  0xed   : > { %2572 = vmatpush1.bf16.msra.mxu1 %v4859_v12  ;;  %v4896_v12 = vld [vmem:[%s6509_s1 + $0x6a8] ss:$16 sps:$4 sm:$0xff]  }
  0xee   : > { %2573 = vmatprep.subr.bf16.mxu1 %v4865_v49  ;;  %v4952_v49 = vld [vmem:[%s6511_s3 + $0xf4] ss:$8 sps:$4 sm:$0xff]  }
  0xef   : > { %3344 = vmatpush1.bf16.msra.mxu0 %v4917_v5 }
  0xf0   : > { %2535 = vmatmul.mubr.bf16.gmra.mrb[48].mxu1 %v5517_v3  ;;  %v4920_v3 = vld [vmem:[%s6511_s3 + $0x50] ss:$8 sps:$4 sm:$0xff]   ;;  %3345 = vmatprep.subr.bf16.mxu0 %v4922_v54  ;;  %v4904_v54 = vld [vmem:[%s6509_s1 + $0x6ec] ss:$16 sps:$4 sm:$0xff]  }
  0xf1   : > { %2343 = vmatmul.mubr.bf16.gmra.mrb[24].mxu0 %v5946_v51  ;;  %2574 = vmatpush1.bf16.msra.mxu1 %v4863_v18 }
  0xf2   : > { %2544 = vmatprep.mubr.bf16.mxu1 %v5537_v13  ;;  %2575 = vmatprep.subr.bf16.mxu1 %v4868_v52  ;;  %v4869_v13 = vld [vmem:[%s6509_s1 + $0x588] ss:$16 sps:$4 sm:$0xff]  }
  0xf3   : > { %3346 = vmatpush1.bf16.msra.mxu0 %v4920_v3 }
  0xf4   : > { %3347 = vmatprep.subr.bf16.mxu0 %v4925_v61 }
  0xf5   : > { %2576 = vmatpush1.bf16.msra.mxu1 %v4866_v58  ;;  %v4902_v58 = vld [vmem:[%s6509_s1 + $0x6e8] ss:$16 sps:$4 sm:$0xff]  }
  0xf6   : > { %2577 = vmatprep.subr.bf16.mxu1 %v4871_v59 }
  0xf7   : > { %3348 = vmatpush1.bf16.msra.mxu0 %v4923_v0 }
  0xf8   : > { %2545 = vmatmul.mubr.bf16.gmra.mrb[52].mxu1 %v5557_v20  ;;  %v4926_v20 = vld [vmem:[%s6511_s3 + $0x70] ss:$8 sps:$4 sm:$0xff]   ;;  %3349 = vmatprep.subr.bf16.mxu0 %v4928_v6 }
  0xf9   : > { %2578 = vmatpush1.bf16.msra.mxu1 %v4869_v13  ;;  %2585 = vmatprep.mubr.bf16.mxu1 %v5572_v26  ;;  %v4875_v26 = vld [vmem:[%s6509_s1 + $0x5c8] ss:$16 sps:$4 sm:$0xff]  }
  0xfa   : > { %2579 = vmatprep.subr.bf16.mxu1 %v4874_v63 }
  0xfb   : > { %3350 = vmatpush1.bf16.msra.mxu0 %v4926_v20 }
  0xfc   : > { %3351 = vmatprep.subr.bf16.mxu0 %v4931_v8 }
  0xfd   : > { %2580 = vmatpush1.bf16.msra.mxu1 %v4872_v23 }
  0xfe   : > { %2581 = vmatprep.subr.bf16.mxu1 %v4877_v7 }
  0xff   : > { %3352 = vmatpush1.bf16.msra.mxu0 %v4929_v31 }
 0x100   : > { %3353 = vmatprep.subr.bf16.mxu0 %v4934_v14 }
 0x101   : > { %2582 = vmatpush1.bf16.msra.mxu1 %v4875_v26 }
 0x102   : > { %2583 = vmatprep.subr.bf16.mxu1 %v4880_v9 }
 0x103   : > { %3354 = vmatpush1.bf16.msra.mxu0 %v4932_v21 }
 0x104   : > { %3355 = vmatprep.subr.bf16.mxu0 %v4937_v22 }
 0x105   : > { %2584 = vmatpush1.bf16.msra.mxu1 %v4878_v16 }
 0x106   : > { %2654 = vmatprep.subr.bf16.mxu1 %v4883_v17  ;;  %v4955_v17 = vld [vmem:[%s6511_s3 + $0x104] ss:$8 sps:$4 sm:$0xff]  }
 0x107   : > { %3356 = vmatpush1.bf16.msra.mxu0 %v4935_v28 }
 0x108   : > { %2586 = vmatmul.mubr.bf16.vlgmr.msra.gmra.mrb[28].mxu1 %v5615_v40  ;;  %v4938_v40 = vld [vmem:[%s6511_s3 + $0xb0] ss:$8 sps:$4 sm:$0xff]   ;;  %3357 = vmatprep.subr.bf16.mxu0 %v4940_v47 }
 0x109   : > { %2655 = vmatpush1.bf16.msra.mxu1 %v4881_v43  ;;  %2595 = vmatprep.mubr.bf16.mxu1 %v5621_v42  ;;  %v4887_v42 = vld [vmem:[%s6509_s1 + $0x648] ss:$16 sps:$4 sm:$0xff]  }
 0x10a   : > { %2656 = vmatprep.subr.bf16.mxu1 %v4886_v25 }
 0x10b   : > { %3358 = vmatpush1.bf16.msra.mxu0 %v4938_v40 }
 0x10c   : > { %3359 = vmatprep.subr.bf16.mxu0 %v4943_v33 }
 0x10d   : > { %2657 = vmatpush1.bf16.msra.mxu1 %v4884_v30 }
 0x10e   : > { %2658 = vmatprep.subr.bf16.mxu1 %v4889_v32 }
 0x10f   : > { %3360 = vmatpush1.bf16.msra.mxu0 %v4941_v50 }
 0x110   : > { %2596 = vmatmul.mubr.bf16.gmra.mrb[32].mxu1 %v5646_v53  ;;  %v4944_v53 = vld [vmem:[%s6511_s3 + $0xd0] ss:$8 sps:$4 sm:$0xff]   ;;  %3361 = vmatprep.subr.bf16.mxu0 %v4946_v44 }
 0x111   : > { %2605 = vmatprep.mubr.bf16.mxu1 %v5652_v57  ;;  %2659 = vmatpush1.bf16.msra.mxu1 %v4887_v42  ;;  %v4893_v57 = vld [vmem:[%s6509_s1 + $0x688] ss:$16 sps:$4 sm:$0xff]  }
 0x112   : > { %2660 = vmatprep.subr.bf16.mxu1 %v4892_v55 }
 0x113   : > { %3362 = vmatpush1.bf16.msra.mxu0 %v4944_v53 }
 0x114   : > { %3363 = vmatprep.subr.bf16.mxu0 %v4949_v2 }
 0x115   : > { %2661 = vmatpush1.bf16.msra.mxu1 %v4890_v60 }
 0x116   : > { %2662 = vmatprep.subr.bf16.mxu1 %v4895_v38 }
 0x117   : > { %3364 = vmatpush1.bf16.msra.mxu0 %v4947_v41 }
 0x118   : > { %2606 = vmatmul.mubr.bf16.gmra.mrb[36].mxu1 %v5677_v1  ;;  %v4950_v1 = vld [vmem:[%s6511_s3 + $0xf0] ss:$8 sps:$4 sm:$0xff]   ;;  %3365 = vmatprep.subr.bf16.mxu0 %v4952_v49 }
 0x119   : > { %2615 = vmatprep.mubr.bf16.mxu1 %v5683_v4  ;;  %2663 = vmatpush1.bf16.msra.mxu1 %v4893_v57 }
 0x11a   : > { %2664 = vmatprep.subr.bf16.mxu1 %v4898_v48 }
 0x11b   : > { %v6100_v18 = vpop.f32.mrb[0].mxu1  ;;  %3366 = vmatpush1.bf16.msra.mxu0 %v4950_v1 }
 0x11c   : > { %v6105_v4 = vpop.f32.mrb[1].mxu1  ;;  %3436 = vmatprep.subr.bf16.mxu0 %v4955_v17 }
 0x11d   : > { %v6107_v52 = vpop.f32.mrb[2].mxu1  ;;  %2665 = vmatpush1.bf16.msra.mxu1 %v4896_v12 }
 0x11e   : > { %v6112_v5 = vpop.f32.mrb[3].mxu1  ;;  %2666 = vmatprep.subr.bf16.mxu1 %v4901_v56 }
 0x120   : > { %2616 = vmatmul.mubr.bf16.gmra.mrb[40].mxu1 %v5708_v10 }
 0x121   : > { %2625 = vmatprep.mubr.bf16.mxu1 %v5714_v15  ;;  %2667 = vmatpush1.bf16.msra.mxu1 %v4899_v62  ;;  %v4953_v62 = vld [vmem:[%s6511_s3 + $0x100] ss:$8 sps:$4 sm:$0xff]  }
 0x122   : > { %2668 = vmatprep.subr.bf16.mxu1 %v4904_v54 }
 0x123   : > { %v6122_v59 = vpop.f32.mrb[4].mxu1 }
 0x124   : > { %v6124_v3 = vpop.f32.mrb[5].mxu1 }
 0x125   : > { %v6126_v61 = vpop.f32.mrb[6].mxu1  ;;  %2669 = vmatpush1.bf16.msra.mxu1 %v4902_v58 }
 0x126   : > { %v6128_v13 = vpop.f32.mrb[7].mxu1 }
 0x128   : > { %2626 = vmatmul.mubr.bf16.gmra.mrb[44].mxu1 %v5739_v24 }
 0x129   : > { %2635 = vmatprep.mubr.bf16.mxu1 %v5745_v27 }
 0x12b   : > { %v6132_v10 = vpop.f32.mrb[8].mxu1 }
 0x12c   : > { %v6134_v15 = vpop.f32.mrb[9].mxu1 }
 0x12d   : > { %v6136_v63 = vpop.f32.mrb[10].mxu1 }
 0x12e   : > { %v6138_v0 = vpop.f32.mrb[11].mxu1 }
 0x130   : > { %2636 = vmatmul.mubr.bf16.gmra.mrb[48].mxu1 %v5771_v34 }
 0x131   : > { %2645 = vmatprep.mubr.bf16.mxu1 %v5776_v36 }
 0x133   : > { %v6142_v6 = vpop.f32.mrb[12].mxu1 }
 0x134   : > { %v6144_v23 = vpop.f32.mrb[13].mxu1 }
 0x135   : > { %v6146_v7 = vpop.f32.mrb[14].mxu1 }
 0x136   : > { %v6148_v24 = vpop.f32.mrb[15].mxu1 }
 0x138   : > { %2646 = vmatmul.mubr.bf16.gmra.mrb[52].mxu1 %v5791_v39 }
 0x139   : > { %2686 = vmatprep.mubr.bf16.mxu1 %v5068_v45 }
 0x13b   : > { %v6152_v27 = vpop.f32.mrb[16].mxu1 }
 0x13c   : > { %v6154_v20 = vpop.f32.mrb[17].mxu1 }
 0x13d   : > { %v6156_v8 = vpop.f32.mrb[18].mxu1 }
 0x13e   : > { %v6158_v34 = vpop.f32.mrb[19].mxu1 }
 0x140   : > { %2687 = vmatmul.mubr.bf16.vlgmr.msra.gmra.mrb[28].mxu1 %v5806_v46 }
 0x141   : > { %2696 = vmatprep.mubr.bf16.mxu1 %v5068_v45 }
 0x143   : > { %v6162_v36 = vpop.f32.mrb[20].mxu1 }
 0x144   : > { %v6164_v26 = vpop.f32.mrb[21].mxu1 }
 0x145   : > { %v6166_v9 = vpop.f32.mrb[22].mxu1 }
 0x146   : > { %v6168_v39 = vpop.f32.mrb[23].mxu1 }
 0x148   : > { %2697 = vmatmul.mubr.bf16.gmra.mrb[32].mxu1 %v5827_v11  ;;  %v566_v11 = vlaneseq }
 0x149   : > { %2706 = vmatprep.mubr.bf16.mxu1 %v5068_v45 }
 0x14a   : > { %v6188_v21 = vshrl.u32 %v566_v11, 7 }
 0x14b   : > { %v6172_v31 = vpop.f32.mrb[24].mxu1 }
 0x14c   : > { %v6174_v14 = vpop.f32.mrb[25].mxu1 }
 0x14d   : > { %v2045_v16 = vpop.f32.mrb[26].mxu1 }
 0x14e   : > { %v2046_v46 = vpop.f32.mrb[27].mxu1 }
 0x150   : > { %2707 = vmatmul.mubr.bf16.gmra.mrb[36].mxu1 %v5845_v19  ;;  %v6191_v19 = vsub.s32 0, %v6188_v21 }
 0x151   : > { %2716 = vmatprep.mubr.bf16.mxu1 %v5068_v45 }
 0x158   : > { %2717 = vmatmul.mubr.bf16.gmra.mrb[40].mxu1 %v5865_v35  ;;  %v6196_v35 = vld [vmem:[%s6510_s2] sm:$0xf] }
 0x159   : > { %2726 = vmatprep.mubr.bf16.mxu1 %v5068_v45 }
 0x160   : > { %2727 = vmatmul.mubr.bf16.gmra.mrb[44].mxu1 %v5890_v29  ;;  %v6199_v29 = vsub.s32 1, %v6188_v21 }
 0x161   : > { %2736 = vmatprep.mubr.bf16.mxu1 %v5068_v45 }
 0x168   : > { %2737 = vmatmul.mubr.bf16.gmra.mrb[48].mxu1 %v5918_v37  ;;  %v6203_v37 = vrot.slane %v6196_v35, %v6191_v19 }
 0x169   : > { %2746 = vmatprep.mubr.bf16.mxu1 %v5068_v45  ;;  %v6207_v45 = vrot.slane %v6196_v35, %v6199_v29 }
 0x16a   : > { %v1986_v25 = vadd.f32 %v6107_v52, %v6203_v37  ;;  %v1992_v53 = vadd.f32 %v6122_v59, %v6203_v37  ;;  %v4958_v59 = vld [vmem:[%s6511_s3 + $0x114] ss:$8 sps:$4 sm:$0xff]  }
 0x16b   : > { %v1984_v22 = vadd.f32 %v6105_v4, %v6207_v45  ;;  %v1988_v30 = vadd.f32 %v6112_v5, %v6207_v45  ;;  %v1994_v48 = vadd.f32 %v6124_v3, %v6207_v45  ;;  %v1998_v5 = vadd.f32 %v6128_v13, %v6207_v45  ;;  %v4956_v13 = vld [vmem:[%s6511_s3 + $0x110] ss:$8 sps:$4 sm:$0xff]  }
 0x170   : > { %2747 = vmatmul.mubr.bf16.gmra.mrb[52].mxu1 %v5946_v51  ;;  %v1982_v51 = vadd.f32 %v6100_v18, %v6203_v37  ;;  %v1996_v18 = vadd.f32 %v6126_v61, %v6203_v37 }
 0x194   : > { %v2284_v43 = vpop.f32.mrb[0].mxu0 }
 0x195   : > { %v4221_v28 = vadd.f32 %v2284_v43, %v1982_v51  ;;  %v2286_v47 = vpop.f32.mrb[1].mxu0  ;;  %v2002_v43 = vadd.f32 %v6132_v10, %v6203_v37  ;;  %v4959_v10 = vld [vmem:[%s6511_s3 + $0x120] ss:$8 sps:$4 sm:$0xff]  }
 0x196   : > { %v4223_v32 = vadd.f32 %v2286_v47, %v1984_v22  ;;  %v2288_v40 = vpop.f32.mrb[2].mxu0  ;;  %v4961_v22 = vld [vmem:[%s6511_s3 + $0x124] ss:$8 sps:$4 sm:$0xff]   ;;  %v2004_v47 = vadd.f32 %v6134_v15, %v6207_v45 }
 0x197   : > { %v2807_v33 = vmul.f32 0.2, %v4221_v28  ;;  %v4225_v42 = vadd.f32 %v2288_v40, %v1986_v25  ;;  %v2290_v55 = vpop.f32.mrb[3].mxu0  ;;  %vm2755_vm0 = vcmp.gt.f32.partialorder %v4221_v28, 0.0 }
 0x198   : > { %v2808_v50 = vmul.f32 0.2, %v4223_v32  ;;  %v4227_v60 = vadd.f32 %v2290_v55, %v1988_v30  ;;  %vm2756_vm1 = vcmp.gt.f32.partialorder %v4223_v32, 0.0 }
 0x199   : > { %vm2759_vm2 = vcmp.gt.f32.partialorder %v4225_v42, 0.0  ;;  %v2811_v44 = vmul.f32 0.2, %v4225_v42  ;;  %v2859_v57 = vsel %vm2755_vm0, %v4221_v28, %v2807_v33 }
 0x19a   : > { %vm2760_vm3 = vcmp.gt.f32.partialorder %v4227_v60, 0.0  ;;  %v2812_v38 = vmul.f32 0.2, %v4227_v60  ;;  %v2860_v49 = vsel %vm2756_vm1, %v4223_v32, %v2808_v50 }
 0x19b   : > { %v2863_v2 = vsel %vm2759_vm2, %v4225_v42, %v2811_v44  ;;  %v2006_v42 = vadd.f32 %v6136_v63, %v6203_v37  ;;  %v2008_v44 = vadd.f32 %v6138_v0, %v6207_v45  ;;  %v4962_v0 = vld [vmem:[%s6511_s3 + $0x130] ss:$8 sps:$4 sm:$0xff]  }
 0x19c   : > { %v2911_v41 = vpack.c.bf16 %v2863_v2, %v2859_v57  ;;  %v2294_v12 = vpop.f32.mrb[4].mxu0  ;;  %v2864_v56 = vsel %vm2760_vm3, %v4227_v60, %v2812_v38 }
 0x19d   : > { %v4229_v1 = vadd.f32 %v2294_v12, %v1992_v53  ;;  %v2296_v4 = vpop.f32.mrb[5].mxu0  ;;  %v2912_v52 = vpack.c.bf16 %v2864_v56, %v2860_v49  ;;  %v4964_v53 = vld [vmem:[%s6511_s3 + $0x134] ss:$8 sps:$4 sm:$0xff]   ;;  %v4967_v56 = vld [vmem:[%s6511_s3 + $0x144] ss:$8 sps:$4 sm:$0xff]  }
 0x19e   : > { %v4231_v54 = vadd.f32 %v2296_v4, %v1994_v48  ;;  %v2298_v58 = vpop.f32.mrb[6].mxu0 }
 0x19f   : > { %v2815_v3 = vmul.f32 0.2, %v4229_v1  ;;  %v4233_v16 = vadd.f32 %v2298_v58, %v1996_v18  ;;  %v2300_v46 = vpop.f32.mrb[7].mxu0  ;;  %3367 = vmatprep.mubr.bf16.mxu0 %v2912_v52  ;;  %vm2763_vm4 = vcmp.gt.f32.partialorder %v4229_v1, 0.0  ;;  %v2012_v18 = vadd.f32 %v6142_v6, %v6203_v37  ;;  %v4965_v6 = vld [vmem:[%s6511_s3 + $0x140] ss:$8 sps:$4 sm:$0xff]  }
 0x1a0   : > { %v2816_v61 = vmul.f32 0.2, %v4231_v54  ;;  %v4235_v17 = vadd.f32 %v2300_v46, %v1998_v5  ;;  %3368 = vmatmul.mubr.bf16.vlgmr.msra.gmra.mrb[28].mxu0 %v2911_v41  ;;  %vm2764_vm5 = vcmp.gt.f32.partialorder %v4231_v54, 0.0  ;;  %v2014_v52 = vadd.f32 %v6144_v23, %v6207_v45 }
 0x1a1   : > { %vm2767_vm6 = vcmp.gt.f32.partialorder %v4233_v16, 0.0  ;;  %v2819_v11 = vmul.f32 0.2, %v4233_v16  ;;  %3437 = vmatpush1.bf16.msra.mxu0 %v4953_v62  ;;  %v2867_v25 = vsel %vm2763_vm4, %v4229_v1, %v2815_v3 }
 0x1a2   : > { %vm2768_vm7 = vcmp.gt.f32.partialorder %v4235_v17, 0.0  ;;  %v2820_v51 = vmul.f32 0.2, %v4235_v17  ;;  %3438 = vmatprep.subr.bf16.mxu0 %v4958_v59  ;;  %v2868_v32 = vsel %vm2764_vm5, %v4231_v54, %v2816_v61  ;;  %v2016_v59 = vadd.f32 %v6146_v7, %v6203_v37 }
 0x1a3   : > { %v2871_v28 = vsel %vm2767_vm6, %v4233_v16, %v2819_v11  ;;  %v2018_v61 = vadd.f32 %v6148_v24, %v6207_v45  ;;  %v4970_v11 = vld [vmem:[%s6511_s3 + $0x154] ss:$8 sps:$4 sm:$0xff]   ;;  %v4968_v24 = vld [vmem:[%s6511_s3 + $0x150] ss:$8 sps:$4 sm:$0xff]  }
 0x1a4   : > { %v2304_v30 = vpop.f32.mrb[8].mxu0  ;;  %v2872_v40 = vsel %vm2768_vm7, %v4235_v17, %v2820_v51  ;;  %v2915_v33 = vpack.c.bf16 %v2871_v28, %v2867_v25 }
 0x1a5   : > { %v4237_v55 = vadd.f32 %v2304_v30, %v2002_v43  ;;  %v2306_v50 = vpop.f32.mrb[9].mxu0  ;;  %v2916_v60 = vpack.c.bf16 %v2872_v40, %v2868_v32  ;;  %3439 = vmatpush1.bf16.msra.mxu0 %v4956_v13  ;;  %v2022_v30 = vadd.f32 %v6152_v27, %v6203_v37  ;;  %v4971_v27 = vld [vmem:[%s6511_s3 + $0x160] ss:$8 sps:$4 sm:$0xff]  }
 0x1a6   : > { %v4239_v38 = vadd.f32 %v2306_v50, %v2004_v47  ;;  %v2308_v15 = vpop.f32.mrb[10].mxu0  ;;  %3440 = vmatprep.subr.bf16.mxu0 %v4961_v22  ;;  %v4973_v47 = vld [vmem:[%s6511_s3 + $0x164] ss:$8 sps:$4 sm:$0xff]  }
 0x1a7   : > { %v2823_v57 = vmul.f32 0.2, %v4237_v55  ;;  %v4241_v63 = vadd.f32 %v2308_v15, %v2006_v42  ;;  %v2310_v2 = vpop.f32.mrb[11].mxu0  ;;  %3377 = vmatprep.mubr.bf16.mxu0 %v2916_v60  ;;  %vm2771_vm8 = vcmp.gt.f32.partialorder %v4237_v55, 0.0 }
 0x1a8   : > { %v2824_v48 = vmul.f32 0.2, %v4239_v38  ;;  %v4243_v41 = vadd.f32 %v2310_v2, %v2008_v44  ;;  %3378 = vmatmul.mubr.bf16.gmra.mrb[32].mxu0 %v2915_v33  ;;  %vm2772_vm9 = vcmp.gt.f32.partialorder %v4239_v38, 0.0  ;;  %v2024_v33 = vadd.f32 %v6154_v20, %v6207_v45 }
 0x1a9   : > { %vm2775_vm10 = vcmp.gt.f32.partialorder %v4241_v63, 0.0  ;;  %v2827_v12 = vmul.f32 0.2, %v4241_v63  ;;  %3441 = vmatpush1.bf16.msra.mxu0 %v4959_v10  ;;  %v2875_v1 = vsel %vm2771_vm8, %v4237_v55, %v2823_v57  ;;  %v2026_v10 = vadd.f32 %v6156_v8, %v6203_v37 }
 0x1aa   : > { %vm2776_vm11 = vcmp.gt.f32.partialorder %v4243_v41, 0.0  ;;  %v2828_v49 = vmul.f32 0.2, %v4243_v41  ;;  %3442 = vmatprep.subr.bf16.mxu0 %v4964_v53  ;;  %v2876_v5 = vsel %vm2772_vm9, %v4239_v38, %v2824_v48  ;;  %v2028_v53 = vadd.f32 %v6158_v34, %v6207_v45  ;;  %v4974_v34 = vld [vmem:[%s6511_s3 + $0x170] ss:$8 sps:$4 sm:$0xff]  }
 0x1ab   : > { %v2879_v4 = vsel %vm2775_vm10, %v4241_v63, %v2827_v12  ;;  %v4976_v63 = vld [vmem:[%s6511_s3 + $0x174] ss:$8 sps:$4 sm:$0xff]  }
 0x1ac   : > { %v2314_v62 = vpop.f32.mrb[12].mxu0  ;;  %v2880_v54 = vsel %vm2776_vm11, %v4243_v41, %v2828_v49  ;;  %v2919_v58 = vpack.c.bf16 %v2879_v4, %v2875_v1 }
 0x1ad   : > { %v4245_v3 = vadd.f32 %v2314_v62, %v2012_v18  ;;  %v2316_v16 = vpop.f32.mrb[13].mxu0  ;;  %v2920_v46 = vpack.c.bf16 %v2880_v54, %v2876_v5  ;;  %3443 = vmatpush1.bf16.msra.mxu0 %v4962_v0  ;;  %v2032_v18 = vadd.f32 %v6162_v36, %v6203_v37  ;;  %v4977_v36 = vld [vmem:[%s6511_s3 + $0x180] ss:$8 sps:$4 sm:$0xff]  }
 0x1ae   : > { %v4247_v17 = vadd.f32 %v2316_v16, %v2014_v52  ;;  %v2318_v23 = vpop.f32.mrb[14].mxu0  ;;  %3444 = vmatprep.subr.bf16.mxu0 %v4967_v56  ;;  %v4979_v56 = vld [vmem:[%s6511_s3 + $0x184] ss:$8 sps:$4 sm:$0xff]   ;;  %v2034_v52 = vadd.f32 %v6164_v26, %v6207_v45 }
 0x1af   : > { %v2831_v13 = vmul.f32 0.2, %v4245_v3  ;;  %v4249_v7 = vadd.f32 %v2318_v23, %v2016_v59  ;;  %v2320_v51 = vpop.f32.mrb[15].mxu0  ;;  %3387 = vmatprep.mubr.bf16.mxu0 %v2920_v46  ;;  %vm2779_vm12 = vcmp.gt.f32.partialorder %v4245_v3, 0.0  ;;  %v2036_v59 = vadd.f32 %v6166_v9, %v6203_v37 }
 0x1b0   : > { %v2832_v22 = vmul.f32 0.2, %v4247_v17  ;;  %v4251_v43 = vadd.f32 %v2320_v51, %v2018_v61  ;;  %3388 = vmatmul.mubr.bf16.gmra.mrb[36].mxu0 %v2919_v58  ;;  %vm2780_vm13 = vcmp.gt.f32.partialorder %v4247_v17, 0.0 }
 0x1b1   : > { %vm2783_vm14 = vcmp.gt.f32.partialorder %v4249_v7, 0.0  ;;  %v2835_v25 = vmul.f32 0.2, %v4249_v7  ;;  %3445 = vmatpush1.bf16.msra.mxu0 %v4965_v6  ;;  %v2883_v32 = vsel %vm2779_vm12, %v4245_v3, %v2831_v13  ;;  %v2038_v6 = vadd.f32 %v6168_v39, %v6207_v45  ;;  %v4980_v39 = vld [vmem:[%s6511_s3 + $0x190] ss:$8 sps:$4 sm:$0xff]  }
 0x1b2   : > { %vm2784_vm15 = vcmp.gt.f32.partialorder %v4251_v43, 0.0  ;;  %v2836_v28 = vmul.f32 0.2, %v4251_v43  ;;  %3446 = vmatprep.subr.bf16.mxu0 %v4970_v11  ;;  %v2884_v55 = vsel %vm2780_vm13, %v4247_v17, %v2832_v22  ;;  %v4982_v17 = vld [vmem:[%s6511_s3 + $0x194] ss:$8 sps:$4 sm:$0xff]  }
 0x1b3   : > { %v2887_v40 = vsel %vm2783_vm14, %v4249_v7, %v2835_v25  ;;  %v2042_v25 = vadd.f32 %v6172_v31, %v6203_v37  ;;  %v4988_v31 = vld [vmem:[%s6511_s3 + $0x1b4] ss:$8 sps:$4 sm:$0xff]  }
 0x1b4   : > { %v2324_v42 = vpop.f32.mrb[16].mxu0  ;;  %v2888_v50 = vsel %vm2784_vm15, %v4251_v43, %v2836_v28  ;;  %v2923_v60 = vpack.c.bf16 %v2887_v40, %v2883_v32  ;;  %v4985_v43 = vld [vmem:[%s6511_s3 + $0x1a4] ss:$8 sps:$4 sm:$0xff]  }
 0x1b5   : > { %v4253_v44 = vadd.f32 %v2324_v42, %v2022_v30  ;;  %v2326_v38 = vpop.f32.mrb[17].mxu0  ;;  %v2924_v15 = vpack.c.bf16 %v2888_v50, %v2884_v55  ;;  %3447 = vmatpush1.bf16.msra.mxu0 %v4968_v24 }
 0x1b6   : > { %v4255_v57 = vadd.f32 %v2326_v38, %v2024_v33  ;;  %v2328_v20 = vpop.f32.mrb[18].mxu0  ;;  %3448 = vmatprep.subr.bf16.mxu0 %v4973_v47  ;;  %v2044_v47 = vadd.f32 %v6174_v14, %v6207_v45  ;;  %v4986_v38 = vld [vmem:[%s6511_s3 + $0x1b0] ss:$8 sps:$4 sm:$0xff]  }
 0x1b7   : > { %v2839_v2 = vmul.f32 0.2, %v4253_v44  ;;  %v4257_v8 = vadd.f32 %v2328_v20, %v2026_v10  ;;  %v2330_v48 = vpop.f32.mrb[19].mxu0  ;;  %3397 = vmatprep.mubr.bf16.mxu0 %v2924_v15  ;;  %vm2787_vm0 = vcmp.gt.f32.partialorder %v4253_v44, 0.0  ;;  %v4989_v20 = vld [vmem:[%s6511_s3 + $0x1c0] ss:$8 sps:$4 sm:$0xff]  }
 0x1b8   : > { %v2840_v41 = vmul.f32 0.2, %v4255_v57  ;;  %v4259_v12 = vadd.f32 %v2330_v48, %v2028_v53  ;;  %3398 = vmatmul.mubr.bf16.gmra.mrb[40].mxu0 %v2923_v60  ;;  %vm2788_vm1 = vcmp.gt.f32.partialorder %v4255_v57, 0.0  ;;  %v4983_v60 = vld [vmem:[%s6511_s3 + $0x1a0] ss:$8 sps:$4 sm:$0xff]  }
 0x1b9   : > { %vm2791_vm2 = vcmp.gt.f32.partialorder %v4257_v8, 0.0  ;;  %v2843_v0 = vmul.f32 0.2, %v4257_v8  ;;  %3449 = vmatpush1.bf16.msra.mxu0 %v4971_v27  ;;  %v2891_v1 = vsel %vm2787_vm0, %v4253_v44, %v2839_v2  ;;  %v4991_v27 = vld [vmem:[%s6511_s3 + $0x1c4] ss:$8 sps:$4 sm:$0xff]  }
 0x1ba   : > { %vm2792_vm3 = vcmp.gt.f32.partialorder %v4259_v12, 0.0  ;;  %v2844_v49 = vmul.f32 0.2, %v4259_v12  ;;  %3450 = vmatprep.subr.bf16.mxu0 %v4976_v63  ;;  %v2892_v5 = vsel %vm2788_vm1, %v4255_v57, %v2840_v41  ;;  %v4994_v2 = vld [vmem:[%s6511_s3 + $0x1d4] ss:$8 sps:$4 sm:$0xff]  }
 0x1bb   : > { %v2895_v4 = vsel %vm2791_vm2, %v4257_v8, %v2843_v0  ;;  %v4992_v8 = vld [vmem:[%s6511_s3 + $0x1d0] ss:$8 sps:$4 sm:$0xff]   ;;  %v4997_v48 = vld [vmem:[%s6511_s3 + $0x1e4] ss:$8 sps:$4 sm:$0xff]   ;;  %v4995_v41 = vld [vmem:[%s6511_s3 + $0x1e0] ss:$8 sps:$4 sm:$0xff]  }
 0x1bc   : > { %v2334_v62 = vpop.f32.mrb[20].mxu0  ;;  %v2896_v54 = vsel %vm2792_vm3, %v4259_v12, %v2844_v49  ;;  %v2927_v58 = vpack.c.bf16 %v2895_v4, %v2891_v1  ;;  %v5000_v12 = vld [vmem:[%s6511_s3 + $0x1f4] ss:$8 sps:$4 sm:$0xff]   ;;  %v4998_v0 = vld [vmem:[%s6511_s3 + $0x1f0] ss:$8 sps:$4 sm:$0xff]   ;;  %v580_v49 = vsub.s32 3, %v6188_v21 }
 0x1bd   : > { %v4261_v3 = vadd.f32 %v2334_v62, %v2032_v18  ;;  %v2336_v16 = vpop.f32.mrb[21].mxu0  ;;  %v2928_v46 = vpack.c.bf16 %v2896_v54, %v2892_v5  ;;  %3451 = vmatpush1.bf16.msra.mxu0 %v4974_v34  ;;  %v576_v34 = vsub.s32 2, %v6188_v21 }
 0x1be   : > { %v4263_v61 = vadd.f32 %v2336_v16, %v2034_v52  ;;  %v2338_v26 = vpop.f32.mrb[22].mxu0  ;;  %3452 = vmatprep.subr.bf16.mxu0 %v4979_v56  ;;  %v6360_v18 = vrot.slane %v6196_v35, %v580_v49 }
 0x1bf   : > { %v2847_v23 = vmul.f32 0.2, %v4261_v3  ;;  %v4265_v9 = vadd.f32 %v2338_v26, %v2036_v59  ;;  %v2340_v11 = vpop.f32.mrb[23].mxu0  ;;  %3407 = vmatprep.mubr.bf16.mxu0 %v2928_v46  ;;  %vm2795_vm4 = vcmp.gt.f32.partialorder %v4261_v3, 0.0  ;;  %v6357_v56 = vrot.slane %v6196_v35, %v576_v34 }
 0x1c0   : > { %v2848_v13 = vmul.f32 0.2, %v4263_v61  ;;  %v4267_v7 = vadd.f32 %v2340_v11, %v2038_v6  ;;  %3408 = vmatmul.mubr.bf16.gmra.mrb[44].mxu0 %v2927_v58  ;;  %vm2796_vm5 = vcmp.gt.f32.partialorder %v4263_v61, 0.0 }
 0x1c1   : > { %vm2799_vm6 = vcmp.gt.f32.partialorder %v4265_v9, 0.0  ;;  %v2851_v51 = vmul.f32 0.2, %v4265_v9  ;;  %3453 = vmatpush1.bf16.msra.mxu0 %v4977_v36  ;;  %v2899_v24 = vsel %vm2795_vm4, %v4261_v3, %v2847_v23 }
 0x1c2   : > { %vm2800_vm7 = vcmp.gt.f32.partialorder %v4267_v7, 0.0  ;;  %v2852_v22 = vmul.f32 0.2, %v4267_v7  ;;  %3454 = vmatprep.subr.bf16.mxu0 %v4982_v17  ;;  %v2900_v32 = vsel %vm2796_vm5, %v4263_v61, %v2848_v13 }
 0x1c3   : > { %v2903_v28 = vsel %vm2799_vm6, %v4265_v9, %v2851_v51 }
 0x1c4   : > { %v2344_v30 = vpop.f32.mrb[24].mxu0  ;;  %v2904_v40 = vsel %vm2800_vm7, %v4267_v7, %v2852_v22  ;;  %v2931_v33 = vpack.c.bf16 %v2903_v28, %v2899_v24 }
 0x1c5   : > { %v4269_v42 = vadd.f32 %v2344_v30, %v2042_v25  ;;  %v2346_v55 = vpop.f32.mrb[25].mxu0  ;;  %v2932_v50 = vpack.c.bf16 %v2904_v40, %v2900_v32  ;;  %3455 = vmatpush1.bf16.msra.mxu0 %v4980_v39 }
 0x1c6   : > { %v4271_v10 = vadd.f32 %v2346_v55, %v2044_v47  ;;  %v2348_v44 = vpop.f32.mrb[26].mxu0  ;;  %3456 = vmatprep.subr.bf16.mxu0 %v4985_v43 }
 0x1c7   : > { %v2855_v14 = vmul.f32 0.2, %v4269_v42  ;;  %v2349_v37 = vpop.f32.mrb[27].mxu0  ;;  %3417 = vmatprep.mubr.bf16.mxu0 %v2932_v50  ;;  %vm2803_vm8 = vcmp.gt.f32.partialorder %v4269_v42, 0.0 }
 0x1c8   : > { %vm2804_vm9 = vcmp.gt.f32.partialorder %v4271_v10, 0.0  ;;  %v2856_v45 = vmul.f32 0.2, %v4271_v10  ;;  %3418 = vmatmul.mubr.bf16.gmra.mrb[48].mxu0 %v2931_v33 }
 0x1c9   : > { %3457 = vmatpush1.bf16.msra.mxu0 %v4983_v60  ;;  %v2907_v57 = vsel %vm2803_vm8, %v4269_v42, %v2855_v14 }
 0x1ca   : > { %v2908_v15 = vsel %vm2804_vm9, %v4271_v10, %v2856_v45  ;;  %3458 = vmatprep.subr.bf16.mxu0 %v4988_v31  ;;  %v2935_v63 = vpack.c.bf16 %v2907_v57, %v2907_v57 }
 0x1cb   : > { %v2936_v53 = vpack.c.bf16 %v2908_v15, %v2908_v15 }
 0x1cd   : > { %3427 = vmatprep.mubr.bf16.mxu0 %v2936_v53  ;;  %3459 = vmatpush1.bf16.msra.mxu0 %v4986_v38 }
 0x1ce   : > { %3460 = vmatprep.subr.bf16.mxu0 %v4991_v27 }
 0x1d0   : > { %3428 = vmatmul.mubr.bf16.gmra.mrb[52].mxu0 %v2935_v63 }
 0x1d1   : > { %3461 = vmatpush1.bf16.msra.mxu0 %v4989_v20 }
 0x1d2   : > { %3462 = vmatprep.subr.bf16.mxu0 %v4994_v2 }
 0x1d5   : > { %3463 = vmatpush1.bf16.msra.mxu0 %v4992_v8 }
 0x1d6   : > { %3464 = vmatprep.subr.bf16.mxu0 %v4997_v48 }
 0x1d9   : > { %3465 = vmatpush1.bf16.msra.mxu0 %v4995_v41 }
 0x1da   : > { %3466 = vmatprep.subr.bf16.mxu0 %v5000_v12 }
 0x1dd   : > { %3467 = vmatpush1.bf16.msra.mxu0 %v4998_v0 }
 0x213   : > { %v2688_v1 = vpop.f32.mrb[28].mxu1 }
 0x214   : > { %v4272_v4 = vadd.f32 %v2688_v1, %v6357_v56  ;;  %v2690_v52 = vpop.f32.mrb[29].mxu1 }
 0x215   : > { %v4273_v62 = vadd.f32 %v2690_v52, %v6360_v18  ;;  %v2692_v5 = vpop.f32.mrb[30].mxu1 }
 0x216   : > { %v2809_v54 = vmul.f32 0.2, %v4272_v4  ;;  %v4274_v58 = vadd.f32 %v2692_v5, %v6357_v56  ;;  %v2694_v59 = vpop.f32.mrb[31].mxu1  ;;  %vm2757_vm10 = vcmp.gt.f32.partialorder %v4272_v4, 0.0 }
 0x217   : > { %v2810_v3 = vmul.f32 0.2, %v4273_v62  ;;  %v4275_v21 = vadd.f32 %v2694_v59, %v6360_v18  ;;  %vm2758_vm11 = vcmp.gt.f32.partialorder %v4273_v62, 0.0 }
 0x218   : > { %vm2761_vm12 = vcmp.gt.f32.partialorder %v4274_v58, 0.0  ;;  %v2813_v16 = vmul.f32 0.2, %v4274_v58  ;;  %v2861_v46 = vsel %vm2757_vm10, %v4272_v4, %v2809_v54 }
 0x219   : > { %vm2762_vm13 = vcmp.gt.f32.partialorder %v4275_v21, 0.0  ;;  %v2814_v35 = vmul.f32 0.2, %v4275_v21  ;;  %v2862_v26 = vsel %vm2758_vm11, %v4273_v62, %v2810_v3 }
 0x21a   : > { %v2865_v36 = vsel %vm2761_vm12, %v4274_v58, %v2813_v16 }
 0x21b   : > { %v2913_v6 = vpack.c.bf16 %v2865_v36, %v2861_v46  ;;  %v2698_v61 = vpop.f32.mrb[32].mxu1  ;;  %v2866_v17 = vsel %vm2762_vm13, %v4275_v21, %v2814_v35 }
 0x21c   : > { %v4276_v23 = vadd.f32 %v2698_v61, %v6357_v56  ;;  %v2700_v9 = vpop.f32.mrb[33].mxu1  ;;  %v2914_v11 = vpack.c.bf16 %v2866_v17, %v2862_v26 }
 0x21d   : > { %v4277_v13 = vadd.f32 %v2700_v9, %v6360_v18  ;;  %v2702_v7 = vpop.f32.mrb[34].mxu1 }
 0x21e   : > { %v2817_v51 = vmul.f32 0.2, %v4276_v23  ;;  %v4278_v39 = vadd.f32 %v2702_v7, %v6357_v56  ;;  %v2704_v22 = vpop.f32.mrb[35].mxu1  ;;  %3468 = vmatprep.mubr.bf16.mxu0 %v2914_v11  ;;  %vm2765_vm14 = vcmp.gt.f32.partialorder %v4276_v23, 0.0 }
 0x21f   : > { %v2818_v43 = vmul.f32 0.2, %v4277_v13  ;;  %v4279_v25 = vadd.f32 %v2704_v22, %v6360_v18  ;;  %3469 = vmatmul.mubr.bf16.vlgmr.msra.gmra.mrb[28].mxu0 %v2913_v6  ;;  %vm2766_vm15 = vcmp.gt.f32.partialorder %v4277_v13, 0.0 }
 0x220   : > { %vm2769_vm0 = vcmp.gt.f32.partialorder %v4278_v39, 0.0  ;;  %v2821_v24 = vmul.f32 0.2, %v4278_v39  ;;  %v2869_v47 = vsel %vm2765_vm14, %v4276_v23, %v2817_v51 }
 0x221   : > { %vm2770_vm1 = vcmp.gt.f32.partialorder %v4279_v25, 0.0  ;;  %v2822_v28 = vmul.f32 0.2, %v4279_v25  ;;  %v2870_v40 = vsel %vm2766_vm15, %v4277_v13, %v2818_v43 }
 0x222   : > { %v2873_v30 = vsel %vm2769_vm0, %v4278_v39, %v2821_v24 }
 0x223   : > { %v2708_v32 = vpop.f32.mrb[36].mxu1  ;;  %v2874_v33 = vsel %vm2770_vm1, %v4279_v25, %v2822_v28  ;;  %v2917_v42 = vpack.c.bf16 %v2873_v30, %v2869_v47 }
 0x224   : > { %v4280_v55 = vadd.f32 %v2708_v32, %v6357_v56  ;;  %v2710_v50 = vpop.f32.mrb[37].mxu1  ;;  %v2918_v60 = vpack.c.bf16 %v2874_v33, %v2870_v40 }
 0x225   : > { %v4281_v10 = vadd.f32 %v2710_v50, %v6360_v18  ;;  %v2712_v44 = vpop.f32.mrb[38].mxu1 }
 0x226   : > { %v2825_v31 = vmul.f32 0.2, %v4280_v55  ;;  %v4282_v14 = vadd.f32 %v2712_v44, %v6357_v56  ;;  %v2714_v37 = vpop.f32.mrb[39].mxu1  ;;  %3478 = vmatprep.mubr.bf16.mxu0 %v2918_v60  ;;  %vm2773_vm2 = vcmp.gt.f32.partialorder %v4280_v55, 0.0 }
 0x227   : > { %v2826_v45 = vmul.f32 0.2, %v4281_v10  ;;  %v4283_v38 = vadd.f32 %v2714_v37, %v6360_v18  ;;  %3479 = vmatmul.mubr.bf16.gmra.mrb[32].mxu0 %v2917_v42  ;;  %vm2774_vm3 = vcmp.gt.f32.partialorder %v4281_v10, 0.0 }
 0x228   : > { %vm2777_vm4 = vcmp.gt.f32.partialorder %v4282_v14, 0.0  ;;  %v2829_v15 = vmul.f32 0.2, %v4282_v14  ;;  %v2877_v53 = vsel %vm2773_vm2, %v4280_v55, %v2825_v31 }
 0x229   : > { %vm2778_vm5 = vcmp.gt.f32.partialorder %v4283_v38, 0.0  ;;  %v2830_v27 = vmul.f32 0.2, %v4283_v38  ;;  %v2878_v63 = vsel %vm2774_vm3, %v4281_v10, %v2826_v45 }
 0x22a   : > { %v2881_v57 = vsel %vm2777_vm4, %v4282_v14, %v2829_v15 }
 0x22b   : > { %v2718_v20 = vpop.f32.mrb[40].mxu1  ;;  %v2882_v2 = vsel %vm2778_vm5, %v4283_v38, %v2830_v27  ;;  %v2921_v8 = vpack.c.bf16 %v2881_v57, %v2877_v53 }
 0x22c   : > { %v4284_v48 = vadd.f32 %v2718_v20, %v6357_v56  ;;  %v2720_v41 = vpop.f32.mrb[41].mxu1  ;;  %v2922_v12 = vpack.c.bf16 %v2882_v2, %v2878_v63 }
 0x22d   : > { %v4285_v0 = vadd.f32 %v2720_v41, %v6360_v18  ;;  %v2722_v34 = vpop.f32.mrb[42].mxu1 }
 0x22e   : > { %v2833_v49 = vmul.f32 0.2, %v4284_v48  ;;  %v4286_v1 = vadd.f32 %v2722_v34, %v6357_v56  ;;  %v2724_v4 = vpop.f32.mrb[43].mxu1  ;;  %3488 = vmatprep.mubr.bf16.mxu0 %v2922_v12  ;;  %vm2781_vm6 = vcmp.gt.f32.partialorder %v4284_v48, 0.0 }
 0x22f   : > { %v2834_v52 = vmul.f32 0.2, %v4285_v0  ;;  %v4287_v62 = vadd.f32 %v2724_v4, %v6360_v18  ;;  %3489 = vmatmul.mubr.bf16.gmra.mrb[36].mxu0 %v2921_v8  ;;  %vm2782_vm7 = vcmp.gt.f32.partialorder %v4285_v0, 0.0  ;;  %v3615_v4 = vld [vmem:[%s6513_s5] sm:$0x3] }
 0x230   : > { %vm2785_vm8 = vcmp.gt.f32.partialorder %v4286_v1, 0.0  ;;  %v2837_v5 = vmul.f32 0.2, %v4286_v1  ;;  %v2885_v58 = vsel %vm2781_vm6, %v4284_v48, %v2833_v49 }
 0x231   : > { %vm2786_vm9 = vcmp.gt.f32.partialorder %v4287_v62, 0.0  ;;  %v2838_v54 = vmul.f32 0.2, %v4287_v62  ;;  %v2886_v21 = vsel %vm2782_vm7, %v4285_v0, %v2834_v52 }
 0x232   : > { %v2889_v59 = vsel %vm2785_vm8, %v4286_v1, %v2837_v5 }
 0x233   : > { %v2728_v3 = vpop.f32.mrb[44].mxu1  ;;  %v2890_v16 = vsel %vm2786_vm9, %v4287_v62, %v2838_v54  ;;  %v2925_v35 = vpack.c.bf16 %v2889_v59, %v2885_v58  ;;  %v6403_v59 = vrot.slane %v3615_v4, %v6191_v19 }
 0x234   : > { %v4288_v46 = vadd.f32 %v2728_v3, %v6357_v56  ;;  %v2730_v36 = vpop.f32.mrb[45].mxu1  ;;  %v2926_v6 = vpack.c.bf16 %v2890_v16, %v2886_v21 }
 0x235   : > { %v4289_v61 = vadd.f32 %v2730_v36, %v6360_v18  ;;  %v2732_v26 = vpop.f32.mrb[46].mxu1 }
 0x236   : > { %v2841_v17 = vmul.f32 0.2, %v4288_v46  ;;  %v4290_v23 = vadd.f32 %v2732_v26, %v6357_v56  ;;  %v2734_v9 = vpop.f32.mrb[47].mxu1  ;;  %3498 = vmatprep.mubr.bf16.mxu0 %v2926_v6  ;;  %vm2789_vm10 = vcmp.gt.f32.partialorder %v4288_v46, 0.0 }
 0x237   : > { %v2842_v11 = vmul.f32 0.2, %v4289_v61  ;;  %v4291_v13 = vadd.f32 %v2734_v9, %v6360_v18  ;;  %3499 = vmatmul.mubr.bf16.gmra.mrb[40].mxu0 %v2925_v35  ;;  %vm2790_vm11 = vcmp.gt.f32.partialorder %v4289_v61, 0.0  ;;  %v6407_v35 = vrot.slane %v3615_v4, %v6199_v29 }
 0x238   : > { %vm2793_vm12 = vcmp.gt.f32.partialorder %v4290_v23, 0.0  ;;  %v2845_v7 = vmul.f32 0.2, %v4290_v23  ;;  %v2893_v39 = vsel %vm2789_vm10, %v4288_v46, %v2841_v17 }
 0x239   : > { %vm2794_vm13 = vcmp.gt.f32.partialorder %v4291_v13, 0.0  ;;  %v2846_v51 = vmul.f32 0.2, %v4291_v13  ;;  %v2894_v25 = vsel %vm2790_vm11, %v4289_v61, %v2842_v11 }
 0x23a   : > { %v2897_v22 = vsel %vm2793_vm12, %v4290_v23, %v2845_v7 }
 0x23b   : > { %v2738_v43 = vpop.f32.mrb[48].mxu1  ;;  %v2898_v24 = vsel %vm2794_vm13, %v4291_v13, %v2846_v51  ;;  %v2929_v28 = vpack.c.bf16 %v2897_v22, %v2893_v39 }
 0x23c   : > { %v4292_v47 = vadd.f32 %v2738_v43, %v6357_v56  ;;  %v2740_v30 = vpop.f32.mrb[49].mxu1  ;;  %v2930_v32 = vpack.c.bf16 %v2898_v24, %v2894_v25 }
 0x23d   : > { %v4293_v40 = vadd.f32 %v2740_v30, %v6360_v18  ;;  %v2742_v33 = vpop.f32.mrb[50].mxu1 }
 0x23e   : > { %v2849_v42 = vmul.f32 0.2, %v4292_v47  ;;  %v4294_v55 = vadd.f32 %v2742_v33, %v6357_v56  ;;  %v2744_v50 = vpop.f32.mrb[51].mxu1  ;;  %3508 = vmatprep.mubr.bf16.mxu0 %v2930_v32  ;;  %vm2797_vm14 = vcmp.gt.f32.partialorder %v4292_v47, 0.0 }
 0x23f   : > { %v2850_v60 = vmul.f32 0.2, %v4293_v40  ;;  %v4295_v10 = vadd.f32 %v2744_v50, %v6360_v18  ;;  %3509 = vmatmul.mubr.bf16.gmra.mrb[44].mxu0 %v2929_v28  ;;  %vm2798_vm15 = vcmp.gt.f32.partialorder %v4293_v40, 0.0 }
 0x240   : > { %vm2801_vm0 = vcmp.gt.f32.partialorder %v4294_v55, 0.0  ;;  %v2853_v44 = vmul.f32 0.2, %v4294_v55  ;;  %v2901_v14 = vsel %vm2797_vm14, %v4292_v47, %v2849_v42 }
 0x241   : > { %vm2802_vm1 = vcmp.gt.f32.partialorder %v4295_v10, 0.0  ;;  %v2854_v31 = vmul.f32 0.2, %v4295_v10  ;;  %v2902_v38 = vsel %vm2798_vm15, %v4293_v40, %v2850_v60 }
 0x242   : > { %v2905_v37 = vsel %vm2801_vm0, %v4294_v55, %v2853_v44 }
 0x243   : > { %v2748_v45 = vpop.f32.mrb[52].mxu1  ;;  %v2906_v15 = vsel %vm2802_vm1, %v4295_v10, %v2854_v31  ;;  %v2933_v27 = vpack.c.bf16 %v2905_v37, %v2901_v14 }
 0x244   : > { %v4296_v53 = vadd.f32 %v2748_v45, %v6357_v56  ;;  %v2750_v57 = vpop.f32.mrb[53].mxu1  ;;  %v2934_v20 = vpack.c.bf16 %v2906_v15, %v2902_v38  ;;  %v3003_v56 = vld [vmem:[%s6512_s4] sm:$0x3] }
 0x245   : > { %v4297_v63 = vadd.f32 %v2750_v57, %v6360_v18  ;;  %v2752_v2 = vpop.f32.mrb[54].mxu1  ;;  %v6392_v18 = vrot.slane %v3003_v56, %v6191_v19  ;;  %v6395_v1 = vrot.slane %v3003_v56, %v6199_v29 }
 0x246   : > { %v2857_v8 = vmul.f32 0.2, %v4296_v53  ;;  %v2753_v48 = vpop.f32.mrb[55].mxu1  ;;  %3518 = vmatprep.mubr.bf16.mxu0 %v2934_v20  ;;  %vm2805_vm2 = vcmp.gt.f32.partialorder %v4296_v53, 0.0 }
 0x247   : > { %vm2806_vm3 = vcmp.gt.f32.partialorder %v4297_v63, 0.0  ;;  %v2858_v41 = vmul.f32 0.2, %v4297_v63  ;;  %3519 = vmatmul.mubr.bf16.gmra.mrb[48].mxu0 %v2933_v27 }
 0x248   : > { %v2909_v34 = vsel %vm2805_vm2, %v4296_v53, %v2857_v8 }
 0x249   : > { %v2910_v12 = vsel %vm2806_vm3, %v4297_v63, %v2858_v41  ;;  %v2937_v49 = vpack.c.bf16 %v2909_v34, %v2909_v34 }
 0x24a   : > { %v2938_v0 = vpack.c.bf16 %v2910_v12, %v2910_v12 }
 0x24c   : > { %3528 = vmatprep.mubr.bf16.mxu0 %v2938_v0 }
 0x24f   : > { %3529 = vmatmul.mubr.bf16.gmra.mrb[52].mxu0 %v2937_v49 }
 0x2f2   : > { %v3470_v52 = vpop.f32.mrb[28].mxu0 }
 0x2f3   : > { %v4298_v62 = vadd.f32 %v3470_v52, %v6392_v18  ;;  %v3472_v5 = vpop.f32.mrb[29].mxu0 }
 0x2f4   : > { %v4299_v54 = vadd.f32 %v3472_v5, %v6395_v1  ;;  %v3474_v58 = vpop.f32.mrb[30].mxu0 }
 0x2f5   : > { %vm3537_vm4 = vcmp.gt.f32.partialorder %v4298_v62, 0.0  ;;  %v3563_v3 = vmul.f32 0.2, %v4298_v62  ;;  %v4300_v21 = vadd.f32 %v3474_v58, %v6392_v18  ;;  %v3476_v16 = vpop.f32.mrb[31].mxu0 }
 0x2f6   : > { %vm3538_vm5 = vcmp.gt.f32.partialorder %v4299_v54, 0.0  ;;  %v3564_v46 = vmul.f32 0.2, %v4299_v54  ;;  %v4301_v36 = vadd.f32 %v3476_v16, %v6395_v1 }
 0x2f7   : > { %vm3539_vm6 = vcmp.gt.f32.partialorder %v4300_v21, 0.0  ;;  %v3565_v6 = vmul.f32 0.2, %v4300_v21  ;;  %v3589_v61 = vsel %vm3537_vm4, %v4298_v62, %v3563_v3 }
 0x2f8   : > { %vm3540_vm7 = vcmp.gt.f32.partialorder %v4301_v36, 0.0  ;;  %v3566_v26 = vmul.f32 0.2, %v4301_v36  ;;  %v3590_v17 = vsel %vm3538_vm5, %v4299_v54, %v3564_v46  ;;  %v3627_v19 = vmul.f32 %v6403_v59, %v3589_v61 }
 0x2f9   : > { %v3628_v23 = vmul.f32 %v6407_v35, %v3590_v17  ;;  %v3591_v9 = vsel %vm3539_vm6, %v4300_v21, %v3565_v6 }
 0x2fa   : > { %v3480_v11 = vpop.f32.mrb[32].mxu0  ;;  %v3592_v13 = vsel %vm3540_vm7, %v4301_v36, %v3566_v26  ;;  %v3629_v29 = vmul.f32 %v6403_v59, %v3591_v9 }
 0x2fb   : > { %v4302_v7 = vadd.f32 %v3480_v11, %v6392_v18  ;;  %v3482_v51 = vpop.f32.mrb[33].mxu0  ;;  %v3653_v39 = vadd.f32 %v3628_v23, %v3627_v19  ;;  %v3630_v22 = vmul.f32 %v6407_v35, %v3592_v13 }
 0x2fc   : > { %v4303_v43 = vadd.f32 %v3482_v51, %v6395_v1  ;;  %v3484_v25 = vpop.f32.mrb[34].mxu0 }
 0x2fd   : > { %vm3541_vm8 = vcmp.gt.f32.partialorder %v4302_v7, 0.0  ;;  %v3567_v24 = vmul.f32 0.2, %v4302_v7  ;;  %v4304_v28 = vadd.f32 %v3484_v25, %v6392_v18  ;;  %v3486_v47 = vpop.f32.mrb[35].mxu0  ;;  %3654 = vadd.xlane.f32.xlu0 %v3653_v39  ;;  %v3656_v30 = vadd.f32 %v3630_v22, %v3629_v29 }
 0x2fe   : > { %vm3542_vm9 = vcmp.gt.f32.partialorder %v4303_v43, 0.0  ;;  %v3568_v32 = vmul.f32 0.2, %v4303_v43  ;;  %v4305_v40 = vadd.f32 %v3486_v47, %v6395_v1 }
 0x2ff   : > { %vm3543_vm10 = vcmp.gt.f32.partialorder %v4304_v28, 0.0  ;;  %v3569_v33 = vmul.f32 0.2, %v4304_v28  ;;  %v3593_v42 = vsel %vm3541_vm8, %v4302_v7, %v3567_v24 }
 0x300   : > { %vm3544_vm11 = vcmp.gt.f32.partialorder %v4305_v40, 0.0  ;;  %v3570_v55 = vmul.f32 0.2, %v4305_v40  ;;  %v3594_v50 = vsel %vm3542_vm9, %v4303_v43, %v3568_v32  ;;  %v3631_v60 = vmul.f32 %v6403_v59, %v3593_v42 }
 0x301   : > { %3657 = vadd.xlane.f32.xlu0 %v3656_v30  ;;  %v3632_v10 = vmul.f32 %v6407_v35, %v3594_v50  ;;  %v3595_v44 = vsel %vm3543_vm10, %v4304_v28, %v3569_v33 }
 0x302   : > { %v3490_v31 = vpop.f32.mrb[36].mxu0  ;;  %v3596_v14 = vsel %vm3544_vm11, %v4305_v40, %v3570_v55  ;;  %v3633_v37 = vmul.f32 %v6403_v59, %v3595_v44 }
 0x303   : > { %v4306_v45 = vadd.f32 %v3490_v31, %v6392_v18  ;;  %v3492_v38 = vpop.f32.mrb[37].mxu0  ;;  %v3659_v15 = vadd.f32 %v3632_v10, %v3631_v60  ;;  %v3634_v27 = vmul.f32 %v6407_v35, %v3596_v14 }
 0x304   : > { %v4307_v53 = vadd.f32 %v3492_v38, %v6395_v1  ;;  %v3494_v57 = vpop.f32.mrb[38].mxu0 }
 0x305   : > { %vm3545_vm12 = vcmp.gt.f32.partialorder %v4306_v45, 0.0  ;;  %v3571_v20 = vmul.f32 0.2, %v4306_v45  ;;  %v4308_v63 = vadd.f32 %v3494_v57, %v6392_v18  ;;  %v3496_v2 = vpop.f32.mrb[39].mxu0  ;;  %3660 = vadd.xlane.f32.xlu1 %v3659_v15  ;;  %v3662_v8 = vadd.f32 %v3634_v27, %v3633_v37 }
 0x306   : > { %vm3546_vm13 = vcmp.gt.f32.partialorder %v4307_v53, 0.0  ;;  %v3572_v48 = vmul.f32 0.2, %v4307_v53  ;;  %v4309_v41 = vadd.f32 %v3496_v2, %v6395_v1 }
 0x307   : > { %vm3547_vm14 = vcmp.gt.f32.partialorder %v4308_v63, 0.0  ;;  %v3573_v12 = vmul.f32 0.2, %v4308_v63  ;;  %v3597_v0 = vsel %vm3545_vm12, %v4306_v45, %v3571_v20 }
 0x308   : > { %vm3548_vm15 = vcmp.gt.f32.partialorder %v4309_v41, 0.0  ;;  %v3574_v34 = vmul.f32 0.2, %v4309_v41  ;;  %v3598_v49 = vsel %vm3546_vm13, %v4307_v53, %v3572_v48  ;;  %v3635_v56 = vmul.f32 %v6403_v59, %v3597_v0 }
 0x309   : > { %3663 = vadd.xlane.f32.xlu1 %v3662_v8  ;;  %v3636_v4 = vmul.f32 %v6407_v35, %v3598_v49  ;;  %v3599_v52 = vsel %vm3547_vm14, %v4308_v63, %v3573_v12  ;;  %vm3790_vm14 = vcmask 7168  }
 0x30a   : > { %v3500_v62 = vpop.f32.mrb[40].mxu0  ;;  %v3600_v5 = vsel %vm3548_vm15, %v4309_v41, %v3574_v34  ;;  %v3637_v54 = vmul.f32 %v6403_v59, %v3599_v52 }
 0x30b   : > { %v4310_v58 = vadd.f32 %v3500_v62, %v6392_v18  ;;  %v3502_v3 = vpop.f32.mrb[41].mxu0  ;;  %v3665_v21 = vadd.f32 %v3636_v4, %v3635_v56  ;;  %v3638_v16 = vmul.f32 %v6407_v35, %v3600_v5 }
 0x30c   : > { %v4311_v46 = vadd.f32 %v3502_v3, %v6395_v1  ;;  %v3504_v36 = vpop.f32.mrb[42].mxu0 }
 0x30d   : > { %vm3549_vm0 = vcmp.gt.f32.partialorder %v4310_v58, 0.0  ;;  %v3575_v6 = vmul.f32 0.2, %v4310_v58  ;;  %v4312_v61 = vadd.f32 %v3504_v36, %v6392_v18  ;;  %v3506_v26 = vpop.f32.mrb[43].mxu0  ;;  %3666 = vadd.xlane.f32.xlu0 %v3665_v21  ;;  %v3668_v17 = vadd.f32 %v3638_v16, %v3637_v54 }
 0x30e   : > { %vm3550_vm1 = vcmp.gt.f32.partialorder %v4311_v46, 0.0  ;;  %v3576_v19 = vmul.f32 0.2, %v4311_v46  ;;  %v4313_v23 = vadd.f32 %v3506_v26, %v6395_v1 }
 0x30f   : > { %vm3551_vm2 = vcmp.gt.f32.partialorder %v4312_v61, 0.0  ;;  %v3577_v9 = vmul.f32 0.2, %v4312_v61  ;;  %3669 = vadd.xlane.f32.xlu1 %v3668_v17  ;;  %v3601_v11 = vsel %vm3549_vm0, %v4310_v58, %v3575_v6 }
 0x310   : > { %vm3552_vm3 = vcmp.gt.f32.partialorder %v4313_v23, 0.0  ;;  %v3578_v13 = vmul.f32 0.2, %v4313_v23  ;;  %v3602_v29 = vsel %vm3550_vm1, %v4311_v46, %v3576_v19  ;;  %v3639_v7 = vmul.f32 %v6403_v59, %v3601_v11 }
 0x311   : > { %v3640_v51 = vmul.f32 %v6407_v35, %v3602_v29  ;;  %v3603_v39 = vsel %vm3551_vm2, %v4312_v61, %v3577_v9 }
 0x312   : > { %v3510_v22 = vpop.f32.mrb[44].mxu0  ;;  %v3604_v43 = vsel %vm3552_vm3, %v4313_v23, %v3578_v13  ;;  %v3641_v25 = vmul.f32 %v6403_v59, %v3603_v39 }
 0x313   : > { %v4314_v24 = vadd.f32 %v3510_v22, %v6392_v18  ;;  %v3512_v28 = vpop.f32.mrb[45].mxu0  ;;  %v3671_v47 = vadd.f32 %v3640_v51, %v3639_v7  ;;  %v3642_v30 = vmul.f32 %v6407_v35, %v3604_v43  ;;  %v6458_v43 = vld [vmem:[#allocation2] ss:$0 sm:$0xff] }
 0x314   : > { %v4315_v32 = vadd.f32 %v3512_v28, %v6395_v1  ;;  %v3514_v40 = vpop.f32.mrb[46].mxu0 }
 0x315   : > { %vm3553_vm4 = vcmp.gt.f32.partialorder %v4314_v24, 0.0  ;;  %v3579_v33 = vmul.f32 0.2, %v4314_v24  ;;  %v4316_v42 = vadd.f32 %v3514_v40, %v6392_v18  ;;  %v3516_v55 = vpop.f32.mrb[47].mxu0  ;;  %3672 = vadd.xlane.f32.xlu0 %v3671_v47  ;;  %v3674_v50 = vadd.f32 %v3642_v30, %v3641_v25 }
 0x316   : > { %vm3554_vm5 = vcmp.gt.f32.partialorder %v4315_v32, 0.0  ;;  %v3580_v60 = vmul.f32 0.2, %v4315_v32  ;;  %v4317_v10 = vadd.f32 %v3516_v55, %v6395_v1 }
 0x317   : > { %vm3555_vm6 = vcmp.gt.f32.partialorder %v4316_v42, 0.0  ;;  %v3581_v44 = vmul.f32 0.2, %v4316_v42  ;;  %3675 = vadd.xlane.f32.xlu1 %v3674_v50  ;;  %v3605_v31 = vsel %vm3553_vm4, %v4314_v24, %v3579_v33 }
 0x318   : > { %vm3556_vm7 = vcmp.gt.f32.partialorder %v4317_v10, 0.0  ;;  %v3582_v14 = vmul.f32 0.2, %v4317_v10  ;;  %v3606_v37 = vsel %vm3554_vm5, %v4315_v32, %v3580_v60  ;;  %v3643_v45 = vmul.f32 %v6403_v59, %v3605_v31 }
 0x319   : > { %v3644_v38 = vmul.f32 %v6407_v35, %v3606_v37  ;;  %v3607_v15 = vsel %vm3555_vm6, %v4316_v42, %v3581_v44 }
 0x31a   : > { %v3520_v27 = vpop.f32.mrb[48].mxu0  ;;  %v3608_v53 = vsel %vm3556_vm7, %v4317_v10, %v3582_v14  ;;  %v3645_v57 = vmul.f32 %v6403_v59, %v3607_v15 }
 0x31b   : > { %v4318_v20 = vadd.f32 %v3520_v27, %v6392_v18  ;;  %v3522_v63 = vpop.f32.mrb[49].mxu0  ;;  %v3677_v2 = vadd.f32 %v3644_v38, %v3643_v45  ;;  %v3646_v8 = vmul.f32 %v6407_v35, %v3608_v53 }
 0x31c   : > { %v4319_v48 = vadd.f32 %v3522_v63, %v6395_v1  ;;  %v3524_v41 = vpop.f32.mrb[50].mxu0 }
 0x31d   : > { %vm3557_vm8 = vcmp.gt.f32.partialorder %v4318_v20, 0.0  ;;  %v3583_v12 = vmul.f32 0.2, %v4318_v20  ;;  %v4320_v0 = vadd.f32 %v3524_v41, %v6392_v18  ;;  %v3526_v34 = vpop.f32.mrb[51].mxu0  ;;  %3678 = vadd.xlane.f32.xlu0 %v3677_v2  ;;  %v3680_v49 = vadd.f32 %v3646_v8, %v3645_v57 }
 0x31e   : > { %vm3558_vm9 = vcmp.gt.f32.partialorder %v4319_v48, 0.0  ;;  %v3584_v56 = vmul.f32 0.2, %v4319_v48  ;;  %v4321_v4 = vadd.f32 %v3526_v34, %v6395_v1 }
 0x31f   : > { %vm3559_vm10 = vcmp.gt.f32.partialorder %v4320_v0, 0.0  ;;  %v3585_v52 = vmul.f32 0.2, %v4320_v0  ;;  %3681 = vadd.xlane.f32.xlu1 %v3680_v49  ;;  %v3609_v62 = vsel %vm3557_vm8, %v4318_v20, %v3583_v12 }
 0x320   : > { %vm3560_vm11 = vcmp.gt.f32.partialorder %v4321_v4, 0.0  ;;  %v3586_v5 = vmul.f32 0.2, %v4321_v4  ;;  %v3610_v54 = vsel %vm3558_vm9, %v4319_v48, %v3584_v56  ;;  %v3647_v58 = vmul.f32 %v6403_v59, %v3609_v62 }
 0x321   : > { %v3648_v3 = vmul.f32 %v6407_v35, %v3610_v54  ;;  %v3611_v21 = vsel %vm3559_vm10, %v4320_v0, %v3585_v52 }
 0x322   : > { %v3530_v16 = vpop.f32.mrb[52].mxu0  ;;  %v3612_v46 = vsel %vm3560_vm11, %v4321_v4, %v3586_v5  ;;  %v3649_v36 = vmul.f32 %v6403_v59, %v3611_v21 }
 0x323   : > { %v4322_v6 = vadd.f32 %v3530_v16, %v6392_v18  ;;  %v3532_v61 = vpop.f32.mrb[53].mxu0  ;;  %v3683_v26 = vadd.f32 %v3648_v3, %v3647_v58  ;;  %v3650_v17 = vmul.f32 %v6407_v35, %v3612_v46 }
 0x324   : > { %v4323_v19 = vadd.f32 %v3532_v61, %v6395_v1  ;;  %v3534_v23 = vpop.f32.mrb[54].mxu0 }
 0x325   : > { %vm3561_vm12 = vcmp.gt.f32.partialorder %v4322_v6, 0.0  ;;  %v3587_v9 = vmul.f32 0.2, %v4322_v6  ;;  %v3535_v11 = vpop.f32.mrb[55].mxu0  ;;  %3684 = vadd.xlane.f32.xlu0 %v3683_v26  ;;  %v3686_v13 = vadd.f32 %v3650_v17, %v3649_v36 }
 0x326   : > { %vm3562_vm13 = vcmp.gt.f32.partialorder %v4323_v19, 0.0  ;;  %v3588_v29 = vmul.f32 0.2, %v4323_v19 }
 0x327   : > { %3687 = vadd.xlane.f32.xlu1 %v3686_v13  ;;  %v3613_v7 = vsel %vm3561_vm12, %v4322_v6, %v3587_v9 }
 0x328   : > { %v3614_v51 = vsel %vm3562_vm13, %v4323_v19, %v3588_v29  ;;  %v3651_v39 = vmul.f32 %v6403_v59, %v3613_v7 }
 0x329   : > { %v3652_v18 = vmul.f32 %v6407_v35, %v3614_v51 }
 0x32b   : > { %v3689_v22 = vadd.f32 %v3652_v18, %v3651_v39 }
 0x32d   : > { %3690 = vadd.xlane.f32.xlu0 %v3689_v22 }
 0x38a   : > { %v3655_v1 = vpop.xlane.xlu0 %3654 }
 0x38b   : > { %v3699_v25 = vadd.f32 %v6458_v43, %v3655_v1 }
 0x38d   : > { %v4205_v24 = vmul.f32 -1.442695, %v3699_v25 }
 0x38e   : > { %v3658_v28 = vpop.xlane.xlu0 %3657 }
 0x38f   : > { %5001 = vpow2.f32 %v4205_v24  ;;  %v3700_v47 = vadd.f32 %v6458_v43, %v3658_v28 }
 0x391   : > { %v4206_v30 = vmul.f32 -1.442695, %v3700_v47 }
 0x392   : > { %v3661_v32 = vpop.xlane.xlu1 %3660 }
 0x393   : > { %5003 = vpow2.f32 %v4206_v30  ;;  %v3701_v40 = vadd.f32 %v6458_v43, %v3661_v32 }
 0x395   : > { %v4207_v59 = vmul.f32 -1.442695, %v3701_v40 }
 0x396   : > { %v3664_v33 = vpop.xlane.xlu1 %3663 }
 0x397   : > { %5005 = vpow2.f32 %v4207_v59  ;;  %v3702_v35 = vadd.f32 %v6458_v43, %v3664_v33 }
 0x399   : > { %v5002_v42 = vpop.eup %5001  ;;  %v4208_v55 = vmul.f32 -1.442695, %v3702_v35 }
 0x39a   : > { %v3751_v50 = vadd.f32 1.0, %v5002_v42  ;;  %v3667_v60 = vpop.xlane.xlu0 %3666 }
 0x39b   : > { %5007 = vpow2.f32 %v4208_v55  ;;  %v3703_v10 = vadd.f32 %v6458_v43, %v3667_v60 }
 0x39c   : > { %5009 = vrcp.f32 %v3751_v50  ;;  %v3670_v44 = vpop.xlane.xlu1 %3669 }
 0x39d   : > { %v5004_v31 = vpop.eup %5003  ;;  %v4209_v14 = vmul.f32 -1.442695, %v3703_v10  ;;  %v3704_v37 = vadd.f32 %v6458_v43, %v3670_v44 }
 0x39e   : > { %v3752_v45 = vadd.f32 1.0, %v5004_v31 }
 0x39f   : > { %5011 = vpow2.f32 %v4209_v14  ;;  %v4210_v38 = vmul.f32 -1.442695, %v3704_v37 }
 0x3a0   : > { %5013 = vrcp.f32 %v3752_v45 }
 0x3a1   : > { %v5006_v15 = vpop.eup %5005  ;;  %5015 = vpow2.f32 %v4210_v38 }
 0x3a2   : > { %v3753_v27 = vadd.f32 1.0, %v5006_v15  ;;  %v3673_v53 = vpop.xlane.xlu0 %3672 }
 0x3a3   : > { %v3705_v57 = vadd.f32 %v6458_v43, %v3673_v53 }
 0x3a4   : > { %5017 = vrcp.f32 %v3753_v27  ;;  %v3676_v20 = vpop.xlane.xlu1 %3675 }
 0x3a5   : > { %v5008_v63 = vpop.eup %5007  ;;  %v4211_v2 = vmul.f32 -1.442695, %v3705_v57  ;;  %v3706_v8 = vadd.f32 %v6458_v43, %v3676_v20 }
 0x3a6   : > { %v5010_v48 = vpop.eup %5009  ;;  %v3754_v41 = vadd.f32 1.0, %v5008_v63 }
 0x3a7   : > { %3791 = vst.msk [vmem:[%s6471_s14] sm:$0xff] %vm3790_vm14, %v5010_v48  ;;  %5019 = vpow2.f32 %v4211_v2  ;;  %v4212_v12 = vmul.f32 -1.442695, %v3706_v8 }
 0x3a8   : > { %5021 = vrcp.f32 %v3754_v41 }
 0x3a9   : > { %v5012_v0 = vpop.eup %5011  ;;  %5023 = vpow2.f32 %v4212_v12 }
 0x3aa   : > { %v5014_v34 = vpop.eup %5013  ;;  %v3755_v49 = vadd.f32 1.0, %v5012_v0  ;;  %v3679_v56 = vpop.xlane.xlu0 %3678 }
 0x3ab   : > { %v5016_v4 = vpop.eup %5015  ;;  %3792 = vst.msk [vmem:[%s6471_s14 + $0x8] sm:$0xff] %vm3790_vm14, %v5014_v34  ;;  %v3707_v52 = vadd.f32 %v6458_v43, %v3679_v56 }
 0x3ac   : > { %5025 = vrcp.f32 %v3755_v49  ;;  %v3756_v62 = vadd.f32 1.0, %v5016_v4  ;;  %v3682_v5 = vpop.xlane.xlu1 %3681 }
 0x3ad   : > { %v4213_v54 = vmul.f32 -1.442695, %v3707_v52  ;;  %v3708_v58 = vadd.f32 %v6458_v43, %v3682_v5 }
 0x3ae   : > { %v5018_v3 = vpop.eup %5017  ;;  %5027 = vrcp.f32 %v3756_v62 }
 0x3af   : > { %3793 = vst.msk [vmem:[%s6471_s14 + $0x10] sm:$0xff] %vm3790_vm14, %v5018_v3  ;;  %5029 = vpow2.f32 %v4213_v54  ;;  %v4214_v21 = vmul.f32 -1.442695, %v3708_v58 }
 0x3b1   : > { %v5020_v16 = vpop.eup %5019  ;;  %5031 = vpow2.f32 %v4214_v21 }
 0x3b2   : > { %v5022_v46 = vpop.eup %5021  ;;  %v3757_v36 = vadd.f32 1.0, %v5020_v16  ;;  %v3685_v6 = vpop.xlane.xlu0 %3684 }
 0x3b3   : > { %v5024_v61 = vpop.eup %5023  ;;  %3794 = vst.msk [vmem:[%s6471_s14 + $0x18] sm:$0xff] %vm3790_vm14, %v5022_v46  ;;  %v3709_v26 = vadd.f32 %v6458_v43, %v3685_v6 }
 0x3b4   : > { %5033 = vrcp.f32 %v3757_v36  ;;  %v3758_v17 = vadd.f32 1.0, %v5024_v61  ;;  %v3688_v19 = vpop.xlane.xlu1 %3687 }
 0x3b5   : > { %v4215_v23 = vmul.f32 -1.442695, %v3709_v26  ;;  %v3710_v9 = vadd.f32 %v6458_v43, %v3688_v19 }
 0x3b6   : > { %v5026_v11 = vpop.eup %5025  ;;  %5035 = vrcp.f32 %v3758_v17 }
 0x3b7   : > { %3795 = vst.msk [vmem:[%s6471_s14 + $0x20] sm:$0xff] %vm3790_vm14, %v5026_v11  ;;  %5037 = vpow2.f32 %v4215_v23  ;;  %v4216_v13 = vmul.f32 -1.442695, %v3710_v9 }
 0x3b8   : > { %v5028_v29 = vpop.eup %5027 }
 0x3b9   : > { %v5030_v7 = vpop.eup %5029  ;;  %3796 = vst.msk [vmem:[%s6471_s14 + $0x28] sm:$0xff] %vm3790_vm14, %v5028_v29  ;;  %5039 = vpow2.f32 %v4216_v13 }
 0x3ba   : > { %v3759_v51 = vadd.f32 1.0, %v5030_v7  ;;  %v3691_v39 = vpop.xlane.xlu0 %3690 }
 0x3bb   : > { %v5032_v18 = vpop.eup %5031  ;;  %v3711_v22 = vadd.f32 %v6458_v43, %v3691_v39 }
 0x3bc   : > { %5041 = vrcp.f32 %v3759_v51  ;;  %v3760_v1 = vadd.f32 1.0, %v5032_v18 }
 0x3bd   : > { %v4217_v25 = vmul.f32 -1.442695, %v3711_v22 }
 0x3be   : > { %v5034_v24 = vpop.eup %5033  ;;  %5043 = vrcp.f32 %v3760_v1 }
 0x3bf   : > { %3797 = vst.msk [vmem:[%s6471_s14 + $0x30] sm:$0xff] %vm3790_vm14, %v5034_v24  ;;  %5045 = vpow2.f32 %v4217_v25 }
 0x3c0   : > { %v5036_v28 = vpop.eup %5035 }
 0x3c1   : > { %v5038_v47 = vpop.eup %5037  ;;  %3798 = vst.msk [vmem:[%s6471_s14 + $0x38] sm:$0xff] %vm3790_vm14, %v5036_v28 }
 0x3c2   : > { %v3761_v30 = vadd.f32 1.0, %v5038_v47 }
 0x3c3   : > { %v5040_v32 = vpop.eup %5039 }
 0x3c4   : > { %5047 = vrcp.f32 %v3761_v30  ;;  %v3762_v43 = vadd.f32 1.0, %v5040_v32 }
 0x3c6   : > { %v5042_v40 = vpop.eup %5041  ;;  %5049 = vrcp.f32 %v3762_v43 }
 0x3c7   : > { %3799 = vst.msk [vmem:[%s6471_s14 + $0x40] sm:$0xff] %vm3790_vm14, %v5042_v40 }
 0x3c8   : > { %v5044_v59 = vpop.eup %5043 }
 0x3c9   : > { %v5046_v33 = vpop.eup %5045  ;;  %3800 = vst.msk [vmem:[%s6471_s14 + $0x48] sm:$0xff] %vm3790_vm14, %v5044_v59 }
 0x3ca   : > { %v3763_v35 = vadd.f32 1.0, %v5046_v33 }
 0x3cc   : > { %5051 = vrcp.f32 %v3763_v35 }
 0x3ce   : > { %v5048_v42 = vpop.eup %5047 }
 0x3cf   : > { %3801 = vst.msk [vmem:[%s6471_s14 + $0x50] sm:$0xff] %vm3790_vm14, %v5048_v42 }
 0x3d0   : > { %v5050_v55 = vpop.eup %5049 }
 0x3d1   : > { %3802 = vst.msk [vmem:[%s6471_s14 + $0x58] sm:$0xff] %vm3790_vm14, %v5050_v55 }
 0x3d6   : > { %v5052_v50 = vpop.eup %5051 }
 0x3d7   : > { %3803 = vst.msk [vmem:[%s6471_s14 + $0x60] sm:$0xff] %vm3790_vm14, %v5052_v50 }
 0x3d8 PF: > { %s19_s26 = sadd.s32 1, %s5066_s26  }
 0x3d9   : > { %p16_p4 = scmp.ge.s32.totalorder %s19_s26, 4  }
 0x3db   :  { %18 = sbr.rel (!%p16_p4) target bundleno = 3 (0x3), region = 78 }

</bundles_post_ra>
